<compile_context>
chip_gen: v7x
topology: tpu7x:2x2x1
jax: 0.10.0
libtpu: 0.0.40
codegen_flags: <defaults>
</compile_context>

<pallas_src>
import jax
import jax.numpy as jnp
from jax import lax
from jax.experimental import pallas as pl
from jax.experimental.pallas import tpu as pltpu
import numpy as np

# ----------------------------- problem sizes ---------------------------------
S = 8    # sequence length
B = 4    # batch
I = 16   # input_size
H = 32   # hidden_size
O = 8    # output_size


# ------------------------------- Pallas kernel -------------------------------
def bilstm_kernel(x_ref,                 # (S, B, I)
                  wih_ref,               # (I, 8H)   [W_ih_f | W_ih_b], gates [i,f,g,o]
                  whh_ref,               # (H, 8H)   [W_hh_f | W_hh_b]
                  b_ref,                 # (1, 8H)   [b_f | b_b] (ih+hh biases fused)
                  wlin_ref,              # (2H, O)
                  blin_ref,              # (1, O)
                  y_ref,                 # (S, B, O)
                  gxf_scr,               # (S*B, 4H) forward input projection
                  gxb_scr,               # (S*B, 4H) backward input projection
                  hf_scr,                # (S*B, H)  forward hidden states (time order)
                  hb_scr):               # (S*B, H)  backward hidden states (time order)
    Sdim, Bdim, Idim = x_ref.shape
    Hdim = whh_ref.shape[0]
    G = 4 * Hdim
    B2 = 2 * Bdim

    # ---- (1) input projection for both directions: one MXU call, bias folded in ----
    xf = x_ref[...].reshape(Sdim * Bdim, Idim)                              # (S*B, I)
    gx = jnp.dot(xf, wih_ref[...], preferred_element_type=jnp.float32) + b_ref[...]
    gxf_scr[...] = gx[:, :G]                                                # forward  gates(x)
    gxb_scr[...] = gx[:, G:]                                                # backward gates(x)

    # ---- loop-invariants hoisted out of the recurrence ----
    whh = whh_ref[...]                                                      # (H, 8H)
    row = lax.broadcasted_iota(jnp.int32, (B2, G), 0)
    is_fwd = row < Bdim                                                     # rows 0:B = forward

    h0 = jnp.zeros((B2, Hdim), jnp.float32)
    c0 = jnp.zeros((B2, Hdim), jnp.float32)

    # ---- (2) merged forward+backward recurrence, fully unrolled ----
    def step(t, carry):
        h, c = carry                                                        # (2B, H) each
        rt = Sdim - 1 - t                                                   # backward time index
        # one recurrent matmul per step for both directions: (2B,H)@(H,8H)
        gh = jnp.dot(h, whh, preferred_element_type=jnp.float32)            # (2B, 8H)
        gx_t = jnp.concatenate(
            [gxf_scr[pl.ds(t * Bdim, Bdim), :],
             gxb_scr[pl.ds(rt * Bdim, Bdim), :]], axis=0)                   # (2B, 4H)
        gates = jnp.where(is_fwd, gh[:, :G], gh[:, G:]) + gx_t              # (2B, 4H)
        i = jax.nn.sigmoid(gates[:, 0 * Hdim:1 * Hdim])
        f = jax.nn.sigmoid(gates[:, 1 * Hdim:2 * Hdim])
        g = jnp.tanh(gates[:, 2 * Hdim:3 * Hdim])
        o = jax.nn.sigmoid(gates[:, 3 * Hdim:4 * Hdim])
        c_new = f * c + i * g
        h_new = o * jnp.tanh(c_new)
        hf_scr[pl.ds(t * Bdim, Bdim), :] = h_new[:Bdim]                     # fwd hidden @ t
        hb_scr[pl.ds(rt * Bdim, Bdim), :] = h_new[Bdim:]                    # bwd hidden @ S-1-t
        return (h_new, c_new)

    lax.fori_loop(0, Sdim, step, (h0, c0), unroll=True)

    # ---- (3) Linear head on flat (S*B, H) buffers: no concat / no 2H reshape ----
    wl = wlin_ref[...]                                                      # (2H, O)
    y = (jnp.dot(hf_scr[...], wl[:Hdim, :], preferred_element_type=jnp.float32)
         + jnp.dot(hb_scr[...], wl[Hdim:, :], preferred_element_type=jnp.float32)
         + blin_ref[...])                                                   # (S*B, O)
    y_ref[...] = y.reshape(Sdim, Bdim, -1).astype(y_ref.dtype)


def lstm_rnn_forward(x, params):
    """x: (S, B, I) float32 -> (S, B, O) float32."""
    wih_cat, whh_cat, b_cat, wlin_t, blin_2d = params
    vmem_spec = pl.BlockSpec(memory_space=pltpu.MemorySpace.VMEM)
    return pl.pallas_call(
        bilstm_kernel,
        out_shape=jax.ShapeDtypeStruct((S, B, O), jnp.float32),
        in_specs=[vmem_spec] * 6,
        out_specs=vmem_spec,
        scratch_shapes=[
            pltpu.VMEM((S * B, 4 * H), jnp.float32),   # forward input projection
            pltpu.VMEM((S * B, 4 * H), jnp.float32),   # backward input projection
            pltpu.VMEM((S * B, H), jnp.float32),       # forward hidden states
            pltpu.VMEM((S * B, H), jnp.float32),       # backward hidden states
        ],
    )(x, wih_cat, whh_cat, b_cat, wlin_t, blin_2d)


# ----------------------------- pure-JAX reference -----------------------------
def _lstm_dir_ref(x_seq, w_ih, w_hh, bias):
    """x_seq: (T, B, I); PyTorch-shaped w_ih (4H, I), w_hh (4H, H), bias = b_ih + b_hh."""
    Hh = w_hh.shape[1]
    Bb = x_seq.shape[1]

    def step(carry, x_t):
        h, c = carry
        gates = x_t @ w_ih.T + h @ w_hh.T + bias
        i, f, g, o = jnp.split(gates, 4, axis=-1)
        i = jax.nn.sigmoid(i); f = jax.nn.sigmoid(f)
        g = jnp.tanh(g); o = jax.nn.sigmoid(o)
        c = f * c + i * g
        h = o * jnp.tanh(c)
        return (h, c), h

    h0 = jnp.zeros((Bb, Hh), jnp.float32)
    c0 = jnp.zeros((Bb, Hh), jnp.float32)
    _, hs = lax.scan(step, (h0, c0), x_seq)
    return hs                                             # (T, B, H)


def lstm_rnn_ref(x, raw):
    (wih_f, whh_f, bih_f, bhh_f, wih_b, whh_b, bih_b, bhh_b, wlin, blin) = raw
    h_f = _lstm_dir_ref(x, wih_f, whh_f, bih_f + bhh_f)
    h_b = _lstm_dir_ref(x[::-1], wih_b, whh_b, bih_b + bhh_b)[::-1]
    h = jnp.concatenate([h_f, h_b], axis=-1)              # (S, B, 2H)
    y = h.reshape(S * B, 2 * H) @ wlin.T + blin
    return y.reshape(S, B, -1)


# --------------------------------- main ---------------------------------------
if __name__ == "__main__":
    key = jax.random.PRNGKey(0)
    keys = jax.random.split(key, 12)

    k_lstm = 1.0 / np.sqrt(H)       # PyTorch LSTM init: U(-1/sqrt(H), 1/sqrt(H))
    k_lin = 1.0 / np.sqrt(2 * H)    # PyTorch Linear init: U(-1/sqrt(fan_in), ...)

    def unif(k, shape, lim):
        return jax.random.uniform(k, shape, jnp.float32, -lim, lim)

    # PyTorch-shaped raw parameters (gate order [i, f, g, o]).
    wih_f = unif(keys[0], (4 * H, I), k_lstm)
    whh_f = unif(keys[1], (4 * H, H), k_lstm)
    bih_f = unif(keys[2], (4 * H,), k_lstm)
    bhh_f = unif(keys[3], (4 * H,), k_lstm)
    wih_b = unif(keys[4], (4 * H, I), k_lstm)
    whh_b = unif(keys[5], (4 * H, H), k_lstm)
    bih_b = unif(keys[6], (4 * H,), k_lstm)
    bhh_b = unif(keys[7], (4 * H,), k_lstm)
    wlin = unif(keys[8], (O, 2 * H), k_lin)
    blin = unif(keys[9], (O,), k_lin)

    # Kernel-layout parameters: transposed, direction-concatenated, biases fused.
    params = (
        jnp.concatenate([wih_f.T, wih_b.T], axis=1),                        # (I, 8H)
        jnp.concatenate([whh_f.T, whh_b.T], axis=1),                        # (H, 8H)
        jnp.concatenate([bih_f + bhh_f, bih_b + bhh_b]).reshape(1, 8 * H),  # (1, 8H)
        wlin.T,                                                             # (2H, O)
        blin.reshape(1, O),                                                 # (1, O)
    )

    x = jax.random.normal(keys[10], (S, B, I), jnp.float32)

    y = lstm_rnn_forward(x, params)
    y = jax.block_until_ready(y)

    y_ref = lstm_rnn_ref(x, (wih_f, whh_f, bih_f, bhh_f,
                             wih_b, whh_b, bih_b, bhh_b, wlin, blin))
    np.testing.assert_allclose(np.asarray(y), np.asarray(y_ref), rtol=1e-3, atol=1e-3)

    print("KERNEL_OK")
</pallas_src>

<mosaic_0001>
module attributes {stable_mosaic.version = 11 : i64} {
  func.func @bilstm_kernel(%arg0: memref<8x4x16xf32, #tpu.memory_space<vmem>>, %arg1: memref<16x256xf32, #tpu.memory_space<vmem>>, %arg2: memref<32x256xf32, #tpu.memory_space<vmem>>, %arg3: memref<1x256xf32, #tpu.memory_space<vmem>>, %arg4: memref<64x8xf32, #tpu.memory_space<vmem>>, %arg5: memref<1x8xf32, #tpu.memory_space<vmem>>, %arg6: memref<8x4x8xf32, #tpu.memory_space<vmem>>, %arg7: memref<32x128xf32, #tpu.memory_space<vmem>>, %arg8: memref<32x128xf32, #tpu.memory_space<vmem>>, %arg9: memref<32x32xf32, #tpu.memory_space<vmem>>, %arg10: memref<32x32xf32, #tpu.memory_space<vmem>>) attributes {dimension_semantics = [], scalar_prefetch = 0 : i64, scratch_operands = 4 : i64, tpu.core_type = #tpu.core_type<tc>} {
    %c0 = arith.constant 0 : index
    %c0_0 = arith.constant 0 : index
    %c0_1 = arith.constant 0 : index
    %0 = vector.load %arg0[%c0, %c0_0, %c0_1] : memref<8x4x16xf32, #tpu.memory_space<vmem>>, vector<8x4x16xf32>
    %1 = vector.shape_cast %0 : vector<8x4x16xf32> to vector<32x16xf32>
    %c0_2 = arith.constant 0 : index
    %c0_3 = arith.constant 0 : index
    %2 = vector.load %arg1[%c0_2, %c0_3] : memref<16x256xf32, #tpu.memory_space<vmem>>, vector<16x256xf32>
    %cst = arith.constant dense<0.000000e+00> : vector<32x256xf32>
    %3 = tpu.matmul %1, %2, %cst {dimension_numbers = #tpu.dot_dimension_numbers<[1], [0], [0], [1], [0, 0, 1, 1], [], []>} : vector<32x16xf32>, vector<16x256xf32>, vector<32x256xf32> -> vector<32x256xf32>
    %c0_4 = arith.constant 0 : index
    %c0_5 = arith.constant 0 : index
    %4 = vector.load %arg3[%c0_4, %c0_5] : memref<1x256xf32, #tpu.memory_space<vmem>>, vector<1x256xf32>
    %5 = vector.broadcast %4 : vector<1x256xf32> to vector<32x256xf32>
    %6 = arith.addf %3, %5 : vector<32x256xf32>
    %7 = vector.extract_strided_slice %6 {offsets = [0, 0], sizes = [32, 128], strides = [1, 1]} : vector<32x256xf32> to vector<32x128xf32>
    %c0_6 = arith.constant 0 : index
    %c0_7 = arith.constant 0 : index
    %8 = vector.load %arg7[%c0_6, %c0_7] : memref<32x128xf32, #tpu.memory_space<vmem>>, vector<32x128xf32>
    tpu.vector_store %arg7[%c0_6, %c0_7], %7 {strides = array<i32>} : memref<32x128xf32, #tpu.memory_space<vmem>>, vector<32x128xf32>,
    %9 = vector.extract_strided_slice %6 {offsets = [0, 128], sizes = [32, 128], strides = [1, 1]} : vector<32x256xf32> to vector<32x128xf32>
    %c0_8 = arith.constant 0 : index
    %c0_9 = arith.constant 0 : index
    %10 = vector.load %arg8[%c0_8, %c0_9] : memref<32x128xf32, #tpu.memory_space<vmem>>, vector<32x128xf32>
    tpu.vector_store %arg8[%c0_8, %c0_9], %9 {strides = array<i32>} : memref<32x128xf32, #tpu.memory_space<vmem>>, vector<32x128xf32>,
    %c0_10 = arith.constant 0 : index
    %c0_11 = arith.constant 0 : index
    %11 = vector.load %arg2[%c0_10, %c0_11] : memref<32x256xf32, #tpu.memory_space<vmem>>, vector<32x256xf32>
    %12 = tpu.iota {dimensions = array<i32: 0>} : vector<8x128xi32>
    %c4_i32 = arith.constant 4 : i32
    %13 = vector.broadcast %c4_i32 : i32 to vector<8x128xi32>
    %14 = arith.cmpi slt, %12, %13 : vector<8x128xi32>
    %cst_12 = arith.constant 0.000000e+00 : f32
    %15 = vector.broadcast %cst_12 : f32 to vector<8x32xf32>
    %cst_13 = arith.constant 0.000000e+00 : f32
    %16 = vector.broadcast %cst_13 : f32 to vector<8x32xf32>
    %c0_i32 = arith.constant 0 : i32
    %c7_i32 = arith.constant 7 : i32
    %17 = arith.subi %c7_i32, %c0_i32 : i32
    %cst_14 = arith.constant dense<0.000000e+00> : vector<8x256xf32>
    %18 = tpu.matmul %15, %11, %cst_14 {dimension_numbers = #tpu.dot_dimension_numbers<[1], [0], [0], [1], [0, 0, 1, 1], [], []>} : vector<8x32xf32>, vector<32x256xf32>, vector<8x256xf32> -> vector<8x256xf32>
    %c4_i32_15 = arith.constant 4 : i32
    %19 = arith.muli %c0_i32, %c4_i32_15 : i32
    %20 = arith.index_cast %19 : i32 to index
    %c0_16 = arith.constant 0 : index
    %21 = vector.load %arg7[%20, %c0_16] : memref<32x128xf32, #tpu.memory_space<vmem>>, vector<4x128xf32>
    %c4_i32_17 = arith.constant 4 : i32
    %22 = arith.muli %17, %c4_i32_17 : i32
    %23 = arith.index_cast %22 : i32 to index
    %c0_18 = arith.constant 0 : index
    %24 = vector.load %arg8[%23, %c0_18] : memref<32x128xf32, #tpu.memory_space<vmem>>, vector<4x128xf32>
    %25 = tpu.concatenate %21, %24 in 0 : vector<4x128xf32>, vector<4x128xf32> -> vector<8x128xf32>
    %26 = vector.extract_strided_slice %18 {offsets = [0, 0], sizes = [8, 128], strides = [1, 1]} : vector<8x256xf32> to vector<8x128xf32>
    %27 = vector.extract_strided_slice %18 {offsets = [0, 128], sizes = [8, 128], strides = [1, 1]} : vector<8x256xf32> to vector<8x128xf32>
    %28 = arith.select %14, %26, %27 : vector<8x128xi1>, vector<8x128xf32>
    %29 = arith.addf %28, %25 : vector<8x128xf32>
    %30 = vector.extract_strided_slice %29 {offsets = [0, 0], sizes = [8, 32], strides = [1, 1]} : vector<8x128xf32> to vector<8x32xf32>
    %31 = arith.negf %30 : vector<8x32xf32>
    %32 = math.exp %31 : vector<8x32xf32>
    %cst_19 = arith.constant 1.000000e+00 : f32
    %33 = vector.broadcast %cst_19 : f32 to vector<8x32xf32>
    %34 = arith.addf %33, %32 : vector<8x32xf32>
    %35 = arith.divf %33, %34 : vector<8x32xf32>
    %36 = vector.extract_strided_slice %29 {offsets = [0, 32], sizes = [8, 32], strides = [1, 1]} : vector<8x128xf32> to vector<8x32xf32>
    %37 = arith.negf %36 : vector<8x32xf32>
    %38 = math.exp %37 : vector<8x32xf32>
    %cst_20 = arith.constant 1.000000e+00 : f32
    %39 = vector.broadcast %cst_20 : f32 to vector<8x32xf32>
    %40 = arith.addf %39, %38 : vector<8x32xf32>
    %41 = arith.divf %39, %40 : vector<8x32xf32>
    %42 = vector.extract_strided_slice %29 {offsets = [0, 64], sizes = [8, 32], strides = [1, 1]} : vector<8x128xf32> to vector<8x32xf32>
    %43 = math.tanh %42 : vector<8x32xf32>
    %44 = vector.extract_strided_slice %29 {offsets = [0, 96], sizes = [8, 32], strides = [1, 1]} : vector<8x128xf32> to vector<8x32xf32>
    %45 = arith.negf %44 : vector<8x32xf32>
    %46 = math.exp %45 : vector<8x32xf32>
    %cst_21 = arith.constant 1.000000e+00 : f32
    %47 = vector.broadcast %cst_21 : f32 to vector<8x32xf32>
    %48 = arith.addf %47, %46 : vector<8x32xf32>
    %49 = arith.divf %47, %48 : vector<8x32xf32>
    %50 = arith.mulf %41, %16 : vector<8x32xf32>
    %51 = arith.mulf %35, %43 : vector<8x32xf32>
    %52 = arith.addf %50, %51 : vector<8x32xf32>
    %53 = math.tanh %52 : vector<8x32xf32>
    %54 = arith.mulf %49, %53 : vector<8x32xf32>
    %55 = vector.extract_strided_slice %54 {offsets = [0, 0], sizes = [4, 32], strides = [1, 1]} : vector<8x32xf32> to vector<4x32xf32>
    %c4_i32_22 = arith.constant 4 : i32
    %56 = arith.muli %c0_i32, %c4_i32_22 : i32
    %57 = arith.index_cast %56 : i32 to index
    %c0_23 = arith.constant 0 : index
    %58 = vector.load %arg9[%57, %c0_23] : memref<32x32xf32, #tpu.memory_space<vmem>>, vector<4x32xf32>
    tpu.vector_store %arg9[%57, %c0_23], %55 {strides = array<i32>} : memref<32x32xf32, #tpu.memory_space<vmem>>, vector<4x32xf32>,
    %59 = vector.extract_strided_slice %54 {offsets = [4, 0], sizes = [4, 32], strides = [1, 1]} : vector<8x32xf32> to vector<4x32xf32>
    %c4_i32_24 = arith.constant 4 : i32
    %60 = arith.muli %17, %c4_i32_24 : i32
    %61 = arith.index_cast %60 : i32 to index
    %c0_25 = arith.constant 0 : index
    %62 = vector.load %arg10[%61, %c0_25] : memref<32x32xf32, #tpu.memory_space<vmem>>, vector<4x32xf32>
    tpu.vector_store %arg10[%61, %c0_25], %59 {strides = array<i32>} : memref<32x32xf32, #tpu.memory_space<vmem>>, vector<4x32xf32>,
    %c1_i32 = arith.constant 1 : i32
    %c7_i32_26 = arith.constant 7 : i32
    %63 = arith.subi %c7_i32_26, %c1_i32 : i32
    %cst_27 = arith.constant dense<0.000000e+00> : vector<8x256xf32>
    %64 = tpu.matmul %54, %11, %cst_27 {dimension_numbers = #tpu.dot_dimension_numbers<[1], [0], [0], [1], [0, 0, 1, 1], [], []>} : vector<8x32xf32>, vector<32x256xf32>, vector<8x256xf32> -> vector<8x256xf32>
    %c4_i32_28 = arith.constant 4 : i32
    %65 = arith.muli %c1_i32, %c4_i32_28 : i32
    %66 = arith.index_cast %65 : i32 to index
    %c0_29 = arith.constant 0 : index
    %67 = vector.load %arg7[%66, %c0_29] : memref<32x128xf32, #tpu.memory_space<vmem>>, vector<4x128xf32>
    %c4_i32_30 = arith.constant 4 : i32
    %68 = arith.muli %63, %c4_i32_30 : i32
    %69 = arith.index_cast %68 : i32 to index
    %c0_31 = arith.constant 0 : index
    %70 = vector.load %arg8[%69, %c0_31] : memref<32x128xf32, #tpu.memory_space<vmem>>, vector<4x128xf32>
    %71 = tpu.concatenate %67, %70 in 0 : vector<4x128xf32>, vector<4x128xf32> -> vector<8x128xf32>
    %72 = vector.extract_strided_slice %64 {offsets = [0, 0], sizes = [8, 128], strides = [1, 1]} : vector<8x256xf32> to vector<8x128xf32>
    %73 = vector.extract_strided_slice %64 {offsets = [0, 128], sizes = [8, 128], strides = [1, 1]} : vector<8x256xf32> to vector<8x128xf32>
    %74 = arith.select %14, %72, %73 : vector<8x128xi1>, vector<8x128xf32>
    %75 = arith.addf %74, %71 : vector<8x128xf32>
    %76 = vector.extract_strided_slice %75 {offsets = [0, 0], sizes = [8, 32], strides = [1, 1]} : vector<8x128xf32> to vector<8x32xf32>
    %77 = arith.negf %76 : vector<8x32xf32>
    %78 = math.exp %77 : vector<8x32xf32>
    %cst_32 = arith.constant 1.000000e+00 : f32
    %79 = vector.broadcast %cst_32 : f32 to vector<8x32xf32>
    %80 = arith.addf %79, %78 : vector<8x32xf32>
    %81 = arith.divf %79, %80 : vector<8x32xf32>
    %82 = vector.extract_strided_slice %75 {offsets = [0, 32], sizes = [8, 32], strides = [1, 1]} : vector<8x128xf32> to vector<8x32xf32>
    %83 = arith.negf %82 : vector<8x32xf32>
    %84 = math.exp %83 : vector<8x32xf32>
    %cst_33 = arith.constant 1.000000e+00 : f32
    %85 = vector.broadcast %cst_33 : f32 to vector<8x32xf32>
    %86 = arith.addf %85, %84 : vector<8x32xf32>
    %87 = arith.divf %85, %86 : vector<8x32xf32>
    %88 = vector.extract_strided_slice %75 {offsets = [0, 64], sizes = [8, 32], strides = [1, 1]} : vector<8x128xf32> to vector<8x32xf32>
    %89 = math.tanh %88 : vector<8x32xf32>
    %90 = vector.extract_strided_slice %75 {offsets = [0, 96], sizes = [8, 32], strides = [1, 1]} : vector<8x128xf32> to vector<8x32xf32>
    %91 = arith.negf %90 : vector<8x32xf32>
    %92 = math.exp %91 : vector<8x32xf32>
    %cst_34 = arith.constant 1.000000e+00 : f32
    %93 = vector.broadcast %cst_34 : f32 to vector<8x32xf32>
    %94 = arith.addf %93, %92 : vector<8x32xf32>
    %95 = arith.divf %93, %94 : vector<8x32xf32>
    %96 = arith.mulf %87, %52 : vector<8x32xf32>
    %97 = arith.mulf %81, %89 : vector<8x32xf32>
    %98 = arith.addf %96, %97 : vector<8x32xf32>
    %99 = math.tanh %98 : vector<8x32xf32>
    %100 = arith.mulf %95, %99 : vector<8x32xf32>
    %101 = vector.extract_strided_slice %100 {offsets = [0, 0], sizes = [4, 32], strides = [1, 1]} : vector<8x32xf32> to vector<4x32xf32>
    %c4_i32_35 = arith.constant 4 : i32
    %102 = arith.muli %c1_i32, %c4_i32_35 : i32
    %103 = arith.index_cast %102 : i32 to index
    %c0_36 = arith.constant 0 : index
    %104 = vector.load %arg9[%103, %c0_36] : memref<32x32xf32, #tpu.memory_space<vmem>>, vector<4x32xf32>
    tpu.vector_store %arg9[%103, %c0_36], %101 {strides = array<i32>} : memref<32x32xf32, #tpu.memory_space<vmem>>, vector<4x32xf32>,
    %105 = vector.extract_strided_slice %100 {offsets = [4, 0], sizes = [4, 32], strides = [1, 1]} : vector<8x32xf32> to vector<4x32xf32>
    %c4_i32_37 = arith.constant 4 : i32
    %106 = arith.muli %63, %c4_i32_37 : i32
    %107 = arith.index_cast %106 : i32 to index
    %c0_38 = arith.constant 0 : index
    %108 = vector.load %arg10[%107, %c0_38] : memref<32x32xf32, #tpu.memory_space<vmem>>, vector<4x32xf32>
    tpu.vector_store %arg10[%107, %c0_38], %105 {strides = array<i32>} : memref<32x32xf32, #tpu.memory_space<vmem>>, vector<4x32xf32>,
    %c2_i32 = arith.constant 2 : i32
    %c7_i32_39 = arith.constant 7 : i32
    %109 = arith.subi %c7_i32_39, %c2_i32 : i32
    %cst_40 = arith.constant dense<0.000000e+00> : vector<8x256xf32>
    %110 = tpu.matmul %100, %11, %cst_40 {dimension_numbers = #tpu.dot_dimension_numbers<[1], [0], [0], [1], [0, 0, 1, 1], [], []>} : vector<8x32xf32>, vector<32x256xf32>, vector<8x256xf32> -> vector<8x256xf32>
    %c4_i32_41 = arith.constant 4 : i32
    %111 = arith.muli %c2_i32, %c4_i32_41 : i32
    %112 = arith.index_cast %111 : i32 to index
    %c0_42 = arith.constant 0 : index
    %113 = vector.load %arg7[%112, %c0_42] : memref<32x128xf32, #tpu.memory_space<vmem>>, vector<4x128xf32>
    %c4_i32_43 = arith.constant 4 : i32
    %114 = arith.muli %109, %c4_i32_43 : i32
    %115 = arith.index_cast %114 : i32 to index
    %c0_44 = arith.constant 0 : index
    %116 = vector.load %arg8[%115, %c0_44] : memref<32x128xf32, #tpu.memory_space<vmem>>, vector<4x128xf32>
    %117 = tpu.concatenate %113, %116 in 0 : vector<4x128xf32>, vector<4x128xf32> -> vector<8x128xf32>
    %118 = vector.extract_strided_slice %110 {offsets = [0, 0], sizes = [8, 128], strides = [1, 1]} : vector<8x256xf32> to vector<8x128xf32>
    %119 = vector.extract_strided_slice %110 {offsets = [0, 128], sizes = [8, 128], strides = [1, 1]} : vector<8x256xf32> to vector<8x128xf32>
    %120 = arith.select %14, %118, %119 : vector<8x128xi1>, vector<8x128xf32>
    %121 = arith.addf %120, %117 : vector<8x128xf32>
    %122 = vector.extract_strided_slice %121 {offsets = [0, 0], sizes = [8, 32], strides = [1, 1]} : vector<8x128xf32> to vector<8x32xf32>
    %123 = arith.negf %122 : vector<8x32xf32>
    %124 = math.exp %123 : vector<8x32xf32>
    %cst_45 = arith.constant 1.000000e+00 : f32
    %125 = vector.broadcast %cst_45 : f32 to vector<8x32xf32>
    %126 = arith.addf %125, %124 : vector<8x32xf32>
    %127 = arith.divf %125, %126 : vector<8x32xf32>
    %128 = vector.extract_strided_slice %121 {offsets = [0, 32], sizes = [8, 32], strides = [1, 1]} : vector<8x128xf32> to vector<8x32xf32>
    %129 = arith.negf %128 : vector<8x32xf32>
    %130 = math.exp %129 : vector<8x32xf32>
    %cst_46 = arith.constant 1.000000e+00 : f32
    %131 = vector.broadcast %cst_46 : f32 to vector<8x32xf32>
    %132 = arith.addf %131, %130 : vector<8x32xf32>
    %133 = arith.divf %131, %132 : vector<8x32xf32>
    %134 = vector.extract_strided_slice %121 {offsets = [0, 64], sizes = [8, 32], strides = [1, 1]} : vector<8x128xf32> to vector<8x32xf32>
    %135 = math.tanh %134 : vector<8x32xf32>
    %136 = vector.extract_strided_slice %121 {offsets = [0, 96], sizes = [8, 32], strides = [1, 1]} : vector<8x128xf32> to vector<8x32xf32>
    %137 = arith.negf %136 : vector<8x32xf32>
    %138 = math.exp %137 : vector<8x32xf32>
    %cst_47 = arith.constant 1.000000e+00 : f32
    %139 = vector.broadcast %cst_47 : f32 to vector<8x32xf32>
    %140 = arith.addf %139, %138 : vector<8x32xf32>
    %141 = arith.divf %139, %140 : vector<8x32xf32>
    %142 = arith.mulf %133, %98 : vector<8x32xf32>
    %143 = arith.mulf %127, %135 : vector<8x32xf32>
    %144 = arith.addf %142, %143 : vector<8x32xf32>
    %145 = math.tanh %144 : vector<8x32xf32>
    %146 = arith.mulf %141, %145 : vector<8x32xf32>
    %147 = vector.extract_strided_slice %146 {offsets = [0, 0], sizes = [4, 32], strides = [1, 1]} : vector<8x32xf32> to vector<4x32xf32>
    %c4_i32_48 = arith.constant 4 : i32
    %148 = arith.muli %c2_i32, %c4_i32_48 : i32
    %149 = arith.index_cast %148 : i32 to index
    %c0_49 = arith.constant 0 : index
    %150 = vector.load %arg9[%149, %c0_49] : memref<32x32xf32, #tpu.memory_space<vmem>>, vector<4x32xf32>
    tpu.vector_store %arg9[%149, %c0_49], %147 {strides = array<i32>} : memref<32x32xf32, #tpu.memory_space<vmem>>, vector<4x32xf32>,
    %151 = vector.extract_strided_slice %146 {offsets = [4, 0], sizes = [4, 32], strides = [1, 1]} : vector<8x32xf32> to vector<4x32xf32>
    %c4_i32_50 = arith.constant 4 : i32
    %152 = arith.muli %109, %c4_i32_50 : i32
    %153 = arith.index_cast %152 : i32 to index
    %c0_51 = arith.constant 0 : index
    %154 = vector.load %arg10[%153, %c0_51] : memref<32x32xf32, #tpu.memory_space<vmem>>, vector<4x32xf32>
    tpu.vector_store %arg10[%153, %c0_51], %151 {strides = array<i32>} : memref<32x32xf32, #tpu.memory_space<vmem>>, vector<4x32xf32>,
    %c3_i32 = arith.constant 3 : i32
    %c7_i32_52 = arith.constant 7 : i32
    %155 = arith.subi %c7_i32_52, %c3_i32 : i32
    %cst_53 = arith.constant dense<0.000000e+00> : vector<8x256xf32>
    %156 = tpu.matmul %146, %11, %cst_53 {dimension_numbers = #tpu.dot_dimension_numbers<[1], [0], [0], [1], [0, 0, 1, 1], [], []>} : vector<8x32xf32>, vector<32x256xf32>, vector<8x256xf32> -> vector<8x256xf32>
    %c4_i32_54 = arith.constant 4 : i32
    %157 = arith.muli %c3_i32, %c4_i32_54 : i32
    %158 = arith.index_cast %157 : i32 to index
    %c0_55 = arith.constant 0 : index
    %159 = vector.load %arg7[%158, %c0_55] : memref<32x128xf32, #tpu.memory_space<vmem>>, vector<4x128xf32>
    %c4_i32_56 = arith.constant 4 : i32
    %160 = arith.muli %155, %c4_i32_56 : i32
    %161 = arith.index_cast %160 : i32 to index
    %c0_57 = arith.constant 0 : index
    %162 = vector.load %arg8[%161, %c0_57] : memref<32x128xf32, #tpu.memory_space<vmem>>, vector<4x128xf32>
    %163 = tpu.concatenate %159, %162 in 0 : vector<4x128xf32>, vector<4x128xf32> -> vector<8x128xf32>
    %164 = vector.extract_strided_slice %156 {offsets = [0, 0], sizes = [8, 128], strides = [1, 1]} : vector<8x256xf32> to vector<8x128xf32>
    %165 = vector.extract_strided_slice %156 {offsets = [0, 128], sizes = [8, 128], strides = [1, 1]} : vector<8x256xf32> to vector<8x128xf32>
    %166 = arith.select %14, %164, %165 : vector<8x128xi1>, vector<8x128xf32>
    %167 = arith.addf %166, %163 : vector<8x128xf32>
    %168 = vector.extract_strided_slice %167 {offsets = [0, 0], sizes = [8, 32], strides = [1, 1]} : vector<8x128xf32> to vector<8x32xf32>
    %169 = arith.negf %168 : vector<8x32xf32>
    %170 = math.exp %169 : vector<8x32xf32>
    %cst_58 = arith.constant 1.000000e+00 : f32
    %171 = vector.broadcast %cst_58 : f32 to vector<8x32xf32>
    %172 = arith.addf %171, %170 : vector<8x32xf32>
    %173 = arith.divf %171, %172 : vector<8x32xf32>
    %174 = vector.extract_strided_slice %167 {offsets = [0, 32], sizes = [8, 32], strides = [1, 1]} : vector<8x128xf32> to vector<8x32xf32>
    %175 = arith.negf %174 : vector<8x32xf32>
    %176 = math.exp %175 : vector<8x32xf32>
    %cst_59 = arith.constant 1.000000e+00 : f32
    %177 = vector.broadcast %cst_59 : f32 to vector<8x32xf32>
    %178 = arith.addf %177, %176 : vector<8x32xf32>
    %179 = arith.divf %177, %178 : vector<8x32xf32>
    %180 = vector.extract_strided_slice %167 {offsets = [0, 64], sizes = [8, 32], strides = [1, 1]} : vector<8x128xf32> to vector<8x32xf32>
    %181 = math.tanh %180 : vector<8x32xf32>
    %182 = vector.extract_strided_slice %167 {offsets = [0, 96], sizes = [8, 32], strides = [1, 1]} : vector<8x128xf32> to vector<8x32xf32>
    %183 = arith.negf %182 : vector<8x32xf32>
    %184 = math.exp %183 : vector<8x32xf32>
    %cst_60 = arith.constant 1.000000e+00 : f32
    %185 = vector.broadcast %cst_60 : f32 to vector<8x32xf32>
    %186 = arith.addf %185, %184 : vector<8x32xf32>
    %187 = arith.divf %185, %186 : vector<8x32xf32>
    %188 = arith.mulf %179, %144 : vector<8x32xf32>
    %189 = arith.mulf %173, %181 : vector<8x32xf32>
    %190 = arith.addf %188, %189 : vector<8x32xf32>
    %191 = math.tanh %190 : vector<8x32xf32>
    %192 = arith.mulf %187, %191 : vector<8x32xf32>
    %193 = vector.extract_strided_slice %192 {offsets = [0, 0], sizes = [4, 32], strides = [1, 1]} : vector<8x32xf32> to vector<4x32xf32>
    %c4_i32_61 = arith.constant 4 : i32
    %194 = arith.muli %c3_i32, %c4_i32_61 : i32
    %195 = arith.index_cast %194 : i32 to index
    %c0_62 = arith.constant 0 : index
    %196 = vector.load %arg9[%195, %c0_62] : memref<32x32xf32, #tpu.memory_space<vmem>>, vector<4x32xf32>
    tpu.vector_store %arg9[%195, %c0_62], %193 {strides = array<i32>} : memref<32x32xf32, #tpu.memory_space<vmem>>, vector<4x32xf32>,
    %197 = vector.extract_strided_slice %192 {offsets = [4, 0], sizes = [4, 32], strides = [1, 1]} : vector<8x32xf32> to vector<4x32xf32>
    %c4_i32_63 = arith.constant 4 : i32
    %198 = arith.muli %155, %c4_i32_63 : i32
    %199 = arith.index_cast %198 : i32 to index
    %c0_64 = arith.constant 0 : index
    %200 = vector.load %arg10[%199, %c0_64] : memref<32x32xf32, #tpu.memory_space<vmem>>, vector<4x32xf32>
    tpu.vector_store %arg10[%199, %c0_64], %197 {strides = array<i32>} : memref<32x32xf32, #tpu.memory_space<vmem>>, vector<4x32xf32>,
    %c4_i32_65 = arith.constant 4 : i32
    %c7_i32_66 = arith.constant 7 : i32
    %201 = arith.subi %c7_i32_66, %c4_i32_65 : i32
    %cst_67 = arith.constant dense<0.000000e+00> : vector<8x256xf32>
    %202 = tpu.matmul %192, %11, %cst_67 {dimension_numbers = #tpu.dot_dimension_numbers<[1], [0], [0], [1], [0, 0, 1, 1], [], []>} : vector<8x32xf32>, vector<32x256xf32>, vector<8x256xf32> -> vector<8x256xf32>
    %c4_i32_68 = arith.constant 4 : i32
    %203 = arith.muli %c4_i32_65, %c4_i32_68 : i32
    %204 = arith.index_cast %203 : i32 to index
    %c0_69 = arith.constant 0 : index
    %205 = vector.load %arg7[%204, %c0_69] : memref<32x128xf32, #tpu.memory_space<vmem>>, vector<4x128xf32>
    %c4_i32_70 = arith.constant 4 : i32
    %206 = arith.muli %201, %c4_i32_70 : i32
    %207 = arith.index_cast %206 : i32 to index
    %c0_71 = arith.constant 0 : index
    %208 = vector.load %arg8[%207, %c0_71] : memref<32x128xf32, #tpu.memory_space<vmem>>, vector<4x128xf32>
    %209 = tpu.concatenate %205, %208 in 0 : vector<4x128xf32>, vector<4x128xf32> -> vector<8x128xf32>
    %210 = vector.extract_strided_slice %202 {offsets = [0, 0], sizes = [8, 128], strides = [1, 1]} : vector<8x256xf32> to vector<8x128xf32>
    %211 = vector.extract_strided_slice %202 {offsets = [0, 128], sizes = [8, 128], strides = [1, 1]} : vector<8x256xf32> to vector<8x128xf32>
    %212 = arith.select %14, %210, %211 : vector<8x128xi1>, vector<8x128xf32>
    %213 = arith.addf %212, %209 : vector<8x128xf32>
    %214 = vector.extract_strided_slice %213 {offsets = [0, 0], sizes = [8, 32], strides = [1, 1]} : vector<8x128xf32> to vector<8x32xf32>
    %215 = arith.negf %214 : vector<8x32xf32>
    %216 = math.exp %215 : vector<8x32xf32>
    %cst_72 = arith.constant 1.000000e+00 : f32
    %217 = vector.broadcast %cst_72 : f32 to vector<8x32xf32>
    %218 = arith.addf %217, %216 : vector<8x32xf32>
    %219 = arith.divf %217, %218 : vector<8x32xf32>
    %220 = vector.extract_strided_slice %213 {offsets = [0, 32], sizes = [8, 32], strides = [1, 1]} : vector<8x128xf32> to vector<8x32xf32>
    %221 = arith.negf %220 : vector<8x32xf32>
    %222 = math.exp %221 : vector<8x32xf32>
    %cst_73 = arith.constant 1.000000e+00 : f32
    %223 = vector.broadcast %cst_73 : f32 to vector<8x32xf32>
    %224 = arith.addf %223, %222 : vector<8x32xf32>
    %225 = arith.divf %223, %224 : vector<8x32xf32>
    %226 = vector.extract_strided_slice %213 {offsets = [0, 64], sizes = [8, 32], strides = [1, 1]} : vector<8x128xf32> to vector<8x32xf32>
    %227 = math.tanh %226 : vector<8x32xf32>
    %228 = vector.extract_strided_slice %213 {offsets = [0, 96], sizes = [8, 32], strides = [1, 1]} : vector<8x128xf32> to vector<8x32xf32>
    %229 = arith.negf %228 : vector<8x32xf32>
    %230 = math.exp %229 : vector<8x32xf32>
    %cst_74 = arith.constant 1.000000e+00 : f32
    %231 = vector.broadcast %cst_74 : f32 to vector<8x32xf32>
    %232 = arith.addf %231, %230 : vector<8x32xf32>
    %233 = arith.divf %231, %232 : vector<8x32xf32>
    %234 = arith.mulf %225, %190 : vector<8x32xf32>
    %235 = arith.mulf %219, %227 : vector<8x32xf32>
    %236 = arith.addf %234, %235 : vector<8x32xf32>
    %237 = math.tanh %236 : vector<8x32xf32>
    %238 = arith.mulf %233, %237 : vector<8x32xf32>
    %239 = vector.extract_strided_slice %238 {offsets = [0, 0], sizes = [4, 32], strides = [1, 1]} : vector<8x32xf32> to vector<4x32xf32>
    %c4_i32_75 = arith.constant 4 : i32
    %240 = arith.muli %c4_i32_65, %c4_i32_75 : i32
    %241 = arith.index_cast %240 : i32 to index
    %c0_76 = arith.constant 0 : index
    %242 = vector.load %arg9[%241, %c0_76] : memref<32x32xf32, #tpu.memory_space<vmem>>, vector<4x32xf32>
    tpu.vector_store %arg9[%241, %c0_76], %239 {strides = array<i32>} : memref<32x32xf32, #tpu.memory_space<vmem>>, vector<4x32xf32>,
    %243 = vector.extract_strided_slice %238 {offsets = [4, 0], sizes = [4, 32], strides = [1, 1]} : vector<8x32xf32> to vector<4x32xf32>
    %c4_i32_77 = arith.constant 4 : i32
    %244 = arith.muli %201, %c4_i32_77 : i32
    %245 = arith.index_cast %244 : i32 to index
    %c0_78 = arith.constant 0 : index
    %246 = vector.load %arg10[%245, %c0_78] : memref<32x32xf32, #tpu.memory_space<vmem>>, vector<4x32xf32>
    tpu.vector_store %arg10[%245, %c0_78], %243 {strides = array<i32>} : memref<32x32xf32, #tpu.memory_space<vmem>>, vector<4x32xf32>,
    %c5_i32 = arith.constant 5 : i32
    %c7_i32_79 = arith.constant 7 : i32
    %247 = arith.subi %c7_i32_79, %c5_i32 : i32
    %cst_80 = arith.constant dense<0.000000e+00> : vector<8x256xf32>
    %248 = tpu.matmul %238, %11, %cst_80 {dimension_numbers = #tpu.dot_dimension_numbers<[1], [0], [0], [1], [0, 0, 1, 1], [], []>} : vector<8x32xf32>, vector<32x256xf32>, vector<8x256xf32> -> vector<8x256xf32>
    %c4_i32_81 = arith.constant 4 : i32
    %249 = arith.muli %c5_i32, %c4_i32_81 : i32
    %250 = arith.index_cast %249 : i32 to index
    %c0_82 = arith.constant 0 : index
    %251 = vector.load %arg7[%250, %c0_82] : memref<32x128xf32, #tpu.memory_space<vmem>>, vector<4x128xf32>
    %c4_i32_83 = arith.constant 4 : i32
    %252 = arith.muli %247, %c4_i32_83 : i32
    %253 = arith.index_cast %252 : i32 to index
    %c0_84 = arith.constant 0 : index
    %254 = vector.load %arg8[%253, %c0_84] : memref<32x128xf32, #tpu.memory_space<vmem>>, vector<4x128xf32>
    %255 = tpu.concatenate %251, %254 in 0 : vector<4x128xf32>, vector<4x128xf32> -> vector<8x128xf32>
    %256 = vector.extract_strided_slice %248 {offsets = [0, 0], sizes = [8, 128], strides = [1, 1]} : vector<8x256xf32> to vector<8x128xf32>
    %257 = vector.extract_strided_slice %248 {offsets = [0, 128], sizes = [8, 128], strides = [1, 1]} : vector<8x256xf32> to vector<8x128xf32>
    %258 = arith.select %14, %256, %257 : vector<8x128xi1>, vector<8x128xf32>
    %259 = arith.addf %258, %255 : vector<8x128xf32>
    %260 = vector.extract_strided_slice %259 {offsets = [0, 0], sizes = [8, 32], strides = [1, 1]} : vector<8x128xf32> to vector<8x32xf32>
    %261 = arith.negf %260 : vector<8x32xf32>
    %262 = math.exp %261 : vector<8x32xf32>
    %cst_85 = arith.constant 1.000000e+00 : f32
    %263 = vector.broadcast %cst_85 : f32 to vector<8x32xf32>
    %264 = arith.addf %263, %262 : vector<8x32xf32>
    %265 = arith.divf %263, %264 : vector<8x32xf32>
    %266 = vector.extract_strided_slice %259 {offsets = [0, 32], sizes = [8, 32], strides = [1, 1]} : vector<8x128xf32> to vector<8x32xf32>
    %267 = arith.negf %266 : vector<8x32xf32>
    %268 = math.exp %267 : vector<8x32xf32>
    %cst_86 = arith.constant 1.000000e+00 : f32
    %269 = vector.broadcast %cst_86 : f32 to vector<8x32xf32>
    %270 = arith.addf %269, %268 : vector<8x32xf32>
    %271 = arith.divf %269, %270 : vector<8x32xf32>
    %272 = vector.extract_strided_slice %259 {offsets = [0, 64], sizes = [8, 32], strides = [1, 1]} : vector<8x128xf32> to vector<8x32xf32>
    %273 = math.tanh %272 : vector<8x32xf32>
    %274 = vector.extract_strided_slice %259 {offsets = [0, 96], sizes = [8, 32], strides = [1, 1]} : vector<8x128xf32> to vector<8x32xf32>
    %275 = arith.negf %274 : vector<8x32xf32>
    %276 = math.exp %275 : vector<8x32xf32>
    %cst_87 = arith.constant 1.000000e+00 : f32
    %277 = vector.broadcast %cst_87 : f32 to vector<8x32xf32>
    %278 = arith.addf %277, %276 : vector<8x32xf32>
    %279 = arith.divf %277, %278 : vector<8x32xf32>
    %280 = arith.mulf %271, %236 : vector<8x32xf32>
    %281 = arith.mulf %265, %273 : vector<8x32xf32>
    %282 = arith.addf %280, %281 : vector<8x32xf32>
    %283 = math.tanh %282 : vector<8x32xf32>
    %284 = arith.mulf %279, %283 : vector<8x32xf32>
    %285 = vector.extract_strided_slice %284 {offsets = [0, 0], sizes = [4, 32], strides = [1, 1]} : vector<8x32xf32> to vector<4x32xf32>
    %c4_i32_88 = arith.constant 4 : i32
    %286 = arith.muli %c5_i32, %c4_i32_88 : i32
    %287 = arith.index_cast %286 : i32 to index
    %c0_89 = arith.constant 0 : index
    %288 = vector.load %arg9[%287, %c0_89] : memref<32x32xf32, #tpu.memory_space<vmem>>, vector<4x32xf32>
    tpu.vector_store %arg9[%287, %c0_89], %285 {strides = array<i32>} : memref<32x32xf32, #tpu.memory_space<vmem>>, vector<4x32xf32>,
    %289 = vector.extract_strided_slice %284 {offsets = [4, 0], sizes = [4, 32], strides = [1, 1]} : vector<8x32xf32> to vector<4x32xf32>
    %c4_i32_90 = arith.constant 4 : i32
    %290 = arith.muli %247, %c4_i32_90 : i32
    %291 = arith.index_cast %290 : i32 to index
    %c0_91 = arith.constant 0 : index
    %292 = vector.load %arg10[%291, %c0_91] : memref<32x32xf32, #tpu.memory_space<vmem>>, vector<4x32xf32>
    tpu.vector_store %arg10[%291, %c0_91], %289 {strides = array<i32>} : memref<32x32xf32, #tpu.memory_space<vmem>>, vector<4x32xf32>,
    %c6_i32 = arith.constant 6 : i32
    %c7_i32_92 = arith.constant 7 : i32
    %293 = arith.subi %c7_i32_92, %c6_i32 : i32
    %cst_93 = arith.constant dense<0.000000e+00> : vector<8x256xf32>
    %294 = tpu.matmul %284, %11, %cst_93 {dimension_numbers = #tpu.dot_dimension_numbers<[1], [0], [0], [1], [0, 0, 1, 1], [], []>} : vector<8x32xf32>, vector<32x256xf32>, vector<8x256xf32> -> vector<8x256xf32>
    %c4_i32_94 = arith.constant 4 : i32
    %295 = arith.muli %c6_i32, %c4_i32_94 : i32
    %296 = arith.index_cast %295 : i32 to index
    %c0_95 = arith.constant 0 : index
    %297 = vector.load %arg7[%296, %c0_95] : memref<32x128xf32, #tpu.memory_space<vmem>>, vector<4x128xf32>
    %c4_i32_96 = arith.constant 4 : i32
    %298 = arith.muli %293, %c4_i32_96 : i32
    %299 = arith.index_cast %298 : i32 to index
    %c0_97 = arith.constant 0 : index
    %300 = vector.load %arg8[%299, %c0_97] : memref<32x128xf32, #tpu.memory_space<vmem>>, vector<4x128xf32>
    %301 = tpu.concatenate %297, %300 in 0 : vector<4x128xf32>, vector<4x128xf32> -> vector<8x128xf32>
    %302 = vector.extract_strided_slice %294 {offsets = [0, 0], sizes = [8, 128], strides = [1, 1]} : vector<8x256xf32> to vector<8x128xf32>
    %303 = vector.extract_strided_slice %294 {offsets = [0, 128], sizes = [8, 128], strides = [1, 1]} : vector<8x256xf32> to vector<8x128xf32>
    %304 = arith.select %14, %302, %303 : vector<8x128xi1>, vector<8x128xf32>
    %305 = arith.addf %304, %301 : vector<8x128xf32>
    %306 = vector.extract_strided_slice %305 {offsets = [0, 0], sizes = [8, 32], strides = [1, 1]} : vector<8x128xf32> to vector<8x32xf32>
    %307 = arith.negf %306 : vector<8x32xf32>
    %308 = math.exp %307 : vector<8x32xf32>
    %cst_98 = arith.constant 1.000000e+00 : f32
    %309 = vector.broadcast %cst_98 : f32 to vector<8x32xf32>
    %310 = arith.addf %309, %308 : vector<8x32xf32>
    %311 = arith.divf %309, %310 : vector<8x32xf32>
    %312 = vector.extract_strided_slice %305 {offsets = [0, 32], sizes = [8, 32], strides = [1, 1]} : vector<8x128xf32> to vector<8x32xf32>
    %313 = arith.negf %312 : vector<8x32xf32>
    %314 = math.exp %313 : vector<8x32xf32>
    %cst_99 = arith.constant 1.000000e+00 : f32
    %315 = vector.broadcast %cst_99 : f32 to vector<8x32xf32>
    %316 = arith.addf %315, %314 : vector<8x32xf32>
    %317 = arith.divf %315, %316 : vector<8x32xf32>
    %318 = vector.extract_strided_slice %305 {offsets = [0, 64], sizes = [8, 32], strides = [1, 1]} : vector<8x128xf32> to vector<8x32xf32>
    %319 = math.tanh %318 : vector<8x32xf32>
    %320 = vector.extract_strided_slice %305 {offsets = [0, 96], sizes = [8, 32], strides = [1, 1]} : vector<8x128xf32> to vector<8x32xf32>
    %321 = arith.negf %320 : vector<8x32xf32>
    %322 = math.exp %321 : vector<8x32xf32>
    %cst_100 = arith.constant 1.000000e+00 : f32
    %323 = vector.broadcast %cst_100 : f32 to vector<8x32xf32>
    %324 = arith.addf %323, %322 : vector<8x32xf32>
    %325 = arith.divf %323, %324 : vector<8x32xf32>
    %326 = arith.mulf %317, %282 : vector<8x32xf32>
    %327 = arith.mulf %311, %319 : vector<8x32xf32>
    %328 = arith.addf %326, %327 : vector<8x32xf32>
    %329 = math.tanh %328 : vector<8x32xf32>
    %330 = arith.mulf %325, %329 : vector<8x32xf32>
    %331 = vector.extract_strided_slice %330 {offsets = [0, 0], sizes = [4, 32], strides = [1, 1]} : vector<8x32xf32> to vector<4x32xf32>
    %c4_i32_101 = arith.constant 4 : i32
    %332 = arith.muli %c6_i32, %c4_i32_101 : i32
    %333 = arith.index_cast %332 : i32 to index
    %c0_102 = arith.constant 0 : index
    %334 = vector.load %arg9[%333, %c0_102] : memref<32x32xf32, #tpu.memory_space<vmem>>, vector<4x32xf32>
    tpu.vector_store %arg9[%333, %c0_102], %331 {strides = array<i32>} : memref<32x32xf32, #tpu.memory_space<vmem>>, vector<4x32xf32>,
    %335 = vector.extract_strided_slice %330 {offsets = [4, 0], sizes = [4, 32], strides = [1, 1]} : vector<8x32xf32> to vector<4x32xf32>
    %c4_i32_103 = arith.constant 4 : i32
    %336 = arith.muli %293, %c4_i32_103 : i32
    %337 = arith.index_cast %336 : i32 to index
    %c0_104 = arith.constant 0 : index
    %338 = vector.load %arg10[%337, %c0_104] : memref<32x32xf32, #tpu.memory_space<vmem>>, vector<4x32xf32>
    tpu.vector_store %arg10[%337, %c0_104], %335 {strides = array<i32>} : memref<32x32xf32, #tpu.memory_space<vmem>>, vector<4x32xf32>,
    %c7_i32_105 = arith.constant 7 : i32
    %c7_i32_106 = arith.constant 7 : i32
    %339 = arith.subi %c7_i32_106, %c7_i32_105 : i32
    %cst_107 = arith.constant dense<0.000000e+00> : vector<8x256xf32>
    %340 = tpu.matmul %330, %11, %cst_107 {dimension_numbers = #tpu.dot_dimension_numbers<[1], [0], [0], [1], [0, 0, 1, 1], [], []>} : vector<8x32xf32>, vector<32x256xf32>, vector<8x256xf32> -> vector<8x256xf32>
    %c4_i32_108 = arith.constant 4 : i32
    %341 = arith.muli %c7_i32_105, %c4_i32_108 : i32
    %342 = arith.index_cast %341 : i32 to index
    %c0_109 = arith.constant 0 : index
    %343 = vector.load %arg7[%342, %c0_109] : memref<32x128xf32, #tpu.memory_space<vmem>>, vector<4x128xf32>
    %c4_i32_110 = arith.constant 4 : i32
    %344 = arith.muli %339, %c4_i32_110 : i32
    %345 = arith.index_cast %344 : i32 to index
    %c0_111 = arith.constant 0 : index
    %346 = vector.load %arg8[%345, %c0_111] : memref<32x128xf32, #tpu.memory_space<vmem>>, vector<4x128xf32>
    %347 = tpu.concatenate %343, %346 in 0 : vector<4x128xf32>, vector<4x128xf32> -> vector<8x128xf32>
    %348 = vector.extract_strided_slice %340 {offsets = [0, 0], sizes = [8, 128], strides = [1, 1]} : vector<8x256xf32> to vector<8x128xf32>
    %349 = vector.extract_strided_slice %340 {offsets = [0, 128], sizes = [8, 128], strides = [1, 1]} : vector<8x256xf32> to vector<8x128xf32>
    %350 = arith.select %14, %348, %349 : vector<8x128xi1>, vector<8x128xf32>
    %351 = arith.addf %350, %347 : vector<8x128xf32>
    %352 = vector.extract_strided_slice %351 {offsets = [0, 0], sizes = [8, 32], strides = [1, 1]} : vector<8x128xf32> to vector<8x32xf32>
    %353 = arith.negf %352 : vector<8x32xf32>
    %354 = math.exp %353 : vector<8x32xf32>
    %cst_112 = arith.constant 1.000000e+00 : f32
    %355 = vector.broadcast %cst_112 : f32 to vector<8x32xf32>
    %356 = arith.addf %355, %354 : vector<8x32xf32>
    %357 = arith.divf %355, %356 : vector<8x32xf32>
    %358 = vector.extract_strided_slice %351 {offsets = [0, 32], sizes = [8, 32], strides = [1, 1]} : vector<8x128xf32> to vector<8x32xf32>
    %359 = arith.negf %358 : vector<8x32xf32>
    %360 = math.exp %359 : vector<8x32xf32>
    %cst_113 = arith.constant 1.000000e+00 : f32
    %361 = vector.broadcast %cst_113 : f32 to vector<8x32xf32>
    %362 = arith.addf %361, %360 : vector<8x32xf32>
    %363 = arith.divf %361, %362 : vector<8x32xf32>
    %364 = vector.extract_strided_slice %351 {offsets = [0, 64], sizes = [8, 32], strides = [1, 1]} : vector<8x128xf32> to vector<8x32xf32>
    %365 = math.tanh %364 : vector<8x32xf32>
    %366 = vector.extract_strided_slice %351 {offsets = [0, 96], sizes = [8, 32], strides = [1, 1]} : vector<8x128xf32> to vector<8x32xf32>
    %367 = arith.negf %366 : vector<8x32xf32>
    %368 = math.exp %367 : vector<8x32xf32>
    %cst_114 = arith.constant 1.000000e+00 : f32
    %369 = vector.broadcast %cst_114 : f32 to vector<8x32xf32>
    %370 = arith.addf %369, %368 : vector<8x32xf32>
    %371 = arith.divf %369, %370 : vector<8x32xf32>
    %372 = arith.mulf %363, %328 : vector<8x32xf32>
    %373 = arith.mulf %357, %365 : vector<8x32xf32>
    %374 = arith.addf %372, %373 : vector<8x32xf32>
    %375 = math.tanh %374 : vector<8x32xf32>
    %376 = arith.mulf %371, %375 : vector<8x32xf32>
    %377 = vector.extract_strided_slice %376 {offsets = [0, 0], sizes = [4, 32], strides = [1, 1]} : vector<8x32xf32> to vector<4x32xf32>
    %c4_i32_115 = arith.constant 4 : i32
    %378 = arith.muli %c7_i32_105, %c4_i32_115 : i32
    %379 = arith.index_cast %378 : i32 to index
    %c0_116 = arith.constant 0 : index
    %380 = vector.load %arg9[%379, %c0_116] : memref<32x32xf32, #tpu.memory_space<vmem>>, vector<4x32xf32>
    tpu.vector_store %arg9[%379, %c0_116], %377 {strides = array<i32>} : memref<32x32xf32, #tpu.memory_space<vmem>>, vector<4x32xf32>,
    %381 = vector.extract_strided_slice %376 {offsets = [4, 0], sizes = [4, 32], strides = [1, 1]} : vector<8x32xf32> to vector<4x32xf32>
    %c4_i32_117 = arith.constant 4 : i32
    %382 = arith.muli %339, %c4_i32_117 : i32
    %383 = arith.index_cast %382 : i32 to index
    %c0_118 = arith.constant 0 : index
    %384 = vector.load %arg10[%383, %c0_118] : memref<32x32xf32, #tpu.memory_space<vmem>>, vector<4x32xf32>
    tpu.vector_store %arg10[%383, %c0_118], %381 {strides = array<i32>} : memref<32x32xf32, #tpu.memory_space<vmem>>, vector<4x32xf32>,
    %c8_i32 = arith.constant 8 : i32
    %c0_119 = arith.constant 0 : index
    %c0_120 = arith.constant 0 : index
    %385 = vector.load %arg4[%c0_119, %c0_120] : memref<64x8xf32, #tpu.memory_space<vmem>>, vector<64x8xf32>
    %c0_121 = arith.constant 0 : index
    %c0_122 = arith.constant 0 : index
    %386 = vector.load %arg9[%c0_121, %c0_122] : memref<32x32xf32, #tpu.memory_space<vmem>>, vector<32x32xf32>
    %387 = vector.extract_strided_slice %385 {offsets = [0, 0], sizes = [32, 8], strides = [1, 1]} : vector<64x8xf32> to vector<32x8xf32>
    %cst_123 = arith.constant dense<0.000000e+00> : vector<32x8xf32>
    %388 = tpu.matmul %386, %387, %cst_123 {dimension_numbers = #tpu.dot_dimension_numbers<[1], [0], [0], [1], [0, 0, 1, 1], [], []>} : vector<32x32xf32>, vector<32x8xf32>, vector<32x8xf32> -> vector<32x8xf32>
    %c0_124 = arith.constant 0 : index
    %c0_125 = arith.constant 0 : index
    %389 = vector.load %arg10[%c0_124, %c0_125] : memref<32x32xf32, #tpu.memory_space<vmem>>, vector<32x32xf32>
    %390 = vector.extract_strided_slice %385 {offsets = [32, 0], sizes = [32, 8], strides = [1, 1]} : vector<64x8xf32> to vector<32x8xf32>
    %cst_126 = arith.constant dense<0.000000e+00> : vector<32x8xf32>
    %391 = tpu.matmul %389, %390, %cst_126 {dimension_numbers = #tpu.dot_dimension_numbers<[1], [0], [0], [1], [0, 0, 1, 1], [], []>} : vector<32x32xf32>, vector<32x8xf32>, vector<32x8xf32> -> vector<32x8xf32>
    %392 = arith.addf %388, %391 : vector<32x8xf32>
    %c0_127 = arith.constant 0 : index
    %c0_128 = arith.constant 0 : index
    %393 = vector.load %arg5[%c0_127, %c0_128] : memref<1x8xf32, #tpu.memory_space<vmem>>, vector<1x8xf32>
    %394 = vector.broadcast %393 : vector<1x8xf32> to vector<32x8xf32>
    %395 = arith.addf %392, %394 : vector<32x8xf32>
    %396 = vector.shape_cast %395 : vector<32x8xf32> to vector<8x4x8xf32>
    %c0_129 = arith.constant 0 : index
    %c0_130 = arith.constant 0 : index
    %c0_131 = arith.constant 0 : index
    %397 = vector.load %arg6[%c0_129, %c0_130, %c0_131] : memref<8x4x8xf32, #tpu.memory_space<vmem>>, vector<8x4x8xf32>
    tpu.vector_store %arg6[%c0_129, %c0_130, %c0_131], %396 {strides = array<i32>} : memref<8x4x8xf32, #tpu.memory_space<vmem>>, vector<8x4x8xf32>,
    return
  }
}

</mosaic_0001>

<bundles_post_ra>
// kernel: tpu_custom_call.1
= control target key start
LH: loop header
LB: loop body
LE: loop exit
PB: predicated region body
PF: predicated region fallthrough
CT: control target
= control target key end

     0   :  { %11 = vsyncpa [#allocation7], 0  ;;  %s1966_s0 = inlined_call_operand.hbm [shape: f32[8,4,16], index: 0, kind: input, shape index: {}]   ;;  %s1967_s1 = inlined_call_operand.hbm [shape: f32[16,256], index: 1, kind: input, shape index: {}]   ;;  %s1968_s2 = inlined_call_operand.vmem [shape: f32[32,256], index: 2, kind: input, shape index: {}]   ;;  %s1969_s3 = inlined_call_operand.vmem [shape: f32[1,256], index: 3, kind: input, shape index: {}]   ;;  %s1970_s4 = inlined_call_operand.vmem [shape: f32[64,8], index: 4, kind: input, shape index: {}]   ;;  %s1971_s5 = inlined_call_operand.vmem [shape: f32[1,8], index: 5, kind: input, shape index: {}]   ;;  %s1972_s6 = inlined_call_operand.hbm [shape: f32[8,4,8], index: 6, kind: output, shape index: {}]  }
   0x1   :  { %12 = vsyncpa [#allocation10], 0 }
   0x2   :  { %13 = vsyncpa [#allocation8], 0  ;;  %s1669_s21 = smov [#allocation6]   ;;  %s1597_s25 = scalar_lea.hbm %s1966_s0, 512 }
   0x3   :  { %s19_s22 = sshll.u32 %s1669_s21, 4  ;;  %p1598_p0 = scmp.ne.s32.totalorder %s1966_s0, %s1597_s25  ;;  %s20_s22 = int_to_ptr.vmem [resolvable:$true] %s19_s22 }
   0x4   :  { %p1601_p1 = scmp.lt.u32.totalorder %s1597_s25, %s1966_s0 }
   0x6   :  { %p1603_p2 = pnand %p1601_p1, %p1598_p0 }
   0x8   :  { %1606 = shalt.err (!%p1603_p2)
}
   0x9   :  { %s1607_s30 = scalar_lea.vmem %s20_s22, 512  ;;  %p1612_p4 = scmp.lt.s32.totalorder %s20_s22, %s20_s22 }
   0xa   :  { %p1608_p3 = scmp.ne.s32.totalorder %s20_s22, %s1607_s30  ;;  %p1613_p5 = scmp.lt.s32.totalorder %s1607_s30, %s1607_s30 }
   0xc   :  { %p1614_p6 = por %p1613_p5, %p1612_p4 }
   0xe   :  { %p1615_p7 = pnand %p1614_p6, %p1608_p3 }
  0x10   :  { %1618 = shalt.err (!%p1615_p7)
}
  0x11   :  { %s1670_s7 = smov 64   ;;  %s1671_s8 = smov 4  }
  0x12   :  { %25 = dma.hbm_to_vmem [thread:$0]  %s1966_s0, 512, %s20_s22, [#allocation7], %s1670_s7, %s1670_s7, %s1671_s8  }
  0x13   :  { %s1672_s11 = smov [#allocation9]   ;;  %s1619_s15 = scalar_lea.hbm %s1967_s1, 512 }
  0x14   :  { %s31_s12 = sshll.u32 %s1672_s11, 4  ;;  %p1620_p8 = scmp.ne.s32.totalorder %s1967_s1, %s1619_s15  ;;  %s32_s12 = int_to_ptr.vmem [resolvable:$true] %s31_s12 }
  0x15   :  { %p1623_p9 = scmp.lt.u32.totalorder %s1619_s15, %s1967_s1 }
  0x17   :  { %p1625_p10 = pnand %p1623_p9, %p1620_p8 }
  0x19   :  { %1628 = shalt.err (!%p1625_p10)
}
  0x1a   :  { %s1629_s20 = scalar_lea.vmem %s32_s12, 512  ;;  %p1634_p12 = scmp.lt.s32.totalorder %s32_s12, %s32_s12 }
  0x1b   :  { %p1630_p11 = scmp.ne.s32.totalorder %s32_s12, %s1629_s20  ;;  %p1635_p13 = scmp.lt.s32.totalorder %s1629_s20, %s1629_s20 }
  0x1d   :  { %p1636_p0 = por %p1635_p13, %p1634_p12 }
  0x1f   :  { %p1637_p1 = pnand %p1636_p0, %p1630_p11 }
  0x21   :  { %1640 = shalt.err (!%p1637_p1)
}
  0x22   :  { %s1673_s0 = smov 256   ;;  %s1674_s21 = smov 16  }
  0x23   :  { %37 = dma.hbm_to_vmem [thread:$0]  %s1967_s1, 512, %s32_s12, [#allocation10], %s1673_s0, %s1673_s0, %s1674_s21  }
  0x24   :  { %1663 = dma.done.wait [#allocation7], 512  }
  0x25   :  { %1664 = vsyncadd [#allocation7], 4294966784 }
  0x26   :  { %1665 = dma.done.wait [#allocation10], 512  }
  0x27   :  { %1666 = vsyncadd [#allocation10], 4294966784  ;;  %v1675_v0 = vmov 0.0   ;;  %v61_v1 = vld [vmem:[#allocation9 + $0x8] sm:$0xff]  ;;  %v63_v2 = vld [vmem:[#allocation9 + $0x18] sm:$0xff]  ;;  %vm88_vm0 = vcmask 130048   ;;  %v66_v23 = vlaneseq }
  0x28   :  { %161 = vmatprep.mubr.f32.mxu0 %v1675_v0  ;;  %173 = vmatprep.mubr.f32.mxu1 %v1675_v0  ;;  %v60_v3 = vld [vmem:[#allocation9] sm:$0xff]  ;;  %v1430_v4 = vpack.c.bf16 %v63_v2, %v61_v1  ;;  %v62_v5 = vld [vmem:[#allocation9 + $0x10] sm:$0xff]  ;;  %v1531_v9 = vld [vmem:[#allocation6 + $0x8] sm:$0xff]   ;;  %vm285_vm2 = vcmask 1043456   ;;  %vm317_vm3 = vcmask 257024   ;;  %vm319_vm4 = vcmask 261124  }
  0x29   :  { %v1432_v6 = vpack.c.bf16 %v62_v5, %v60_v3  ;;  %v1529_v7 = vld [vmem:[#allocation6] sm:$0xff]   ;;  %v1530_v8 = vld [vmem:[#allocation6 + $0x10] sm:$0xff]   ;;  %v1532_v10 = vld [vmem:[#allocation6 + $0x18] sm:$0xff]   ;;  %v1798_v24 = vshrl.u32 %v66_v23, 7  ;;  %vm205_vm5 = vcmask 261120   ;;  %vm1331_vm6 = vcmask 60416  }
  0x2a   :  { %1431 = vmatprep.subr.bf16.mxu0 %v1430_v4  ;;  %1514 = vmatprep.subr.bf16.mxu1 %v1430_v4  ;;  %v195_v11 = vld [vmem:[%s1968_s2 + $0x8] sm:$0xff]  ;;  %v197_v12 = vld [vmem:[%s1968_s2 + $0x18] sm:$0xff]  ;;  %v194_v14 = vld [vmem:[%s1968_s2] sm:$0xff]  ;;  %s1677_s11 = smov [#allocation11]  }
  0x2b   :  { %1433 = vmatpush1.bf16.msra.mxu0 %v1432_v6  ;;  %1515 = vmatpush1.bf16.msra.mxu1 %v1432_v6  ;;  %v1748_v13 = vpack.c.bf16 %v197_v12, %v195_v11  ;;  %v196_v15 = vld [vmem:[%s1968_s2 + $0x10] sm:$0xff]  ;;  %v199_v16 = vld [vmem:[%s1968_s2 + $0x28] sm:$0xff]  ;;  %v201_v18 = vld [vmem:[%s1968_s2 + $0x38] sm:$0xff]  ;;  %v68_v25 = vsub.s32 0, %v1798_v24  ;;  %v72_v27 = vsub.s32 1, %v1798_v24  ;;  %vm204_vm1 = vcmp.lt.s32.totalorder %v1798_v24, 4 }
  0x2c   :  { %v1761_v17 = vpack.c.bf16 %v196_v15, %v194_v14  ;;  %v198_v19 = vld [vmem:[%s1968_s2 + $0x20] sm:$0xff]  ;;  %v200_v20 = vld [vmem:[%s1968_s2 + $0x30] sm:$0xff]  ;;  %v1774_v21 = vpack.c.bf16 %v201_v18, %v199_v16  ;;  %s1345_s12 = sshll.u32 %s1677_s11, 4  ;;  %s1346_s12 = int_to_ptr.vmem [resolvable:$true] %s1345_s12 }
  0x2d   :  { %1435 = vmatprep.subr.bf16.mxu1 %v1748_v13  ;;  %1451 = vmatprep.subr.bf16.mxu0 %v1748_v13  ;;  %v1779_v22 = vpack.c.bf16 %v200_v20, %v198_v19  ;;  %v64_v26 = vld [vmem:[%s1969_s3] sm:$0x3]  ;;  %s1676_s3 = smov 32   ;;  %p1646_p3 = scmp.lt.s32.totalorder %s1346_s12, %s1346_s12 }
  0x2e   :  { %1358 = vmatmul.mubr.msk.f32.vlgmr.msra.gmra.mrb[0].mxu0 %vm88_vm0, %v1529_v7  ;;  %1360 = vmatmul.mubr.msk.f32.vlgmr.msra.gmra.mrb[0].mxu1 %vm88_vm0, %v1530_v8  ;;  %v69_v28 = vrot.slane %v64_v26, %v68_v25  ;;  %v73_v29 = vrot.slane %v64_v26, %v72_v27 }
  0x2f   :  { %167 = vmatprep.mubr.f32.mxu0 %v1675_v0  ;;  %179 = vmatprep.mubr.f32.mxu1 %v1675_v0 }
  0x30   :  { %1437 = vmatpush1.bf16.msra.mxu1 %v1761_v17  ;;  %1453 = vmatpush1.bf16.msra.mxu0 %v1761_v17 }
  0x31   :  { %1439 = vmatprep.subr.bf16.mxu1 %v1774_v21  ;;  %1455 = vmatprep.subr.bf16.mxu0 %v1774_v21 }
  0x32   :  { %1359 = vmatmul.mubr.msk.f32.gmra.mrb[2].mxu0 %vm88_vm0, %v1531_v9  ;;  %1361 = vmatmul.mubr.msk.f32.gmra.mrb[2].mxu1 %vm88_vm0, %v1532_v10 }
  0x33   :  { %273 = vmatprep.mubr.f32.mxu1 %v1675_v0  ;;  %498 = vmatprep.mubr.f32.mxu0 %v1675_v0 }
  0x34   :  { %1441 = vmatpush1.bf16.msra.mxu1 %v1779_v22  ;;  %1457 = vmatpush1.bf16.msra.mxu0 %v1779_v22 }
  0x35   :  { %1443 = vmatprep.subr.bf16.mxu1 %v1748_v13  ;;  %1467 = vmatprep.subr.bf16.mxu0 %v1748_v13 }
  0x37   :  { %274 = vmatmul.mubr.f32.vlgmr.msra.gmra.mrb[4].mxu1 %v1675_v0 }
  0x38   :  { %1445 = vmatpush1.bf16.msra.mxu1 %v1761_v17  ;;  %387 = vmatprep.mubr.f32.mxu1 %v1675_v0 }
  0x39   :  { %1447 = vmatprep.subr.bf16.mxu1 %v1774_v21 }
  0x3c   :  { %1449 = vmatpush1.bf16.msra.mxu1 %v1779_v22 }
  0x3d   :  { %1459 = vmatprep.subr.bf16.mxu1 %v1748_v13 }
 0x101   :  { %v175_v30 = vpop.f32.mrb[0].mxu1  ;;  %v163_v31 = vpop.f32.mrb[0].mxu0 }
 0x102   :  { %v176_v32 = vadd.f32 %v175_v30, %v69_v28  ;;  %v164_v33 = vadd.f32 %v163_v31, %v69_v28  ;;  %v177_v34 = vpop.f32.mrb[1].mxu1  ;;  %v165_v35 = vpop.f32.mrb[1].mxu0 }
 0x103   :  { %v178_v36 = vadd.f32 %v177_v34, %v73_v29  ;;  %v166_v37 = vadd.f32 %v165_v35, %v73_v29 }
 0x104   :  { %188 = vst [vmem:[#allocation2 + $0x10] sm:$0xff] %v176_v32  ;;  %186 = vst [vmem:[#allocation2] sm:$0xff] %v164_v33 }
 0x105   :  { %192 = vst [vmem:[#allocation3 + $0x10] sm:$0xff] %v178_v36  ;;  %190 = vst [vmem:[#allocation3] sm:$0xff] %v166_v37  ;;  %v169_v38 = vpop.f32.mrb[2].mxu0  ;;  %v181_v39 = vpop.f32.mrb[2].mxu1 }
 0x106   :  { %v170_v40 = vadd.f32 %v169_v38, %v69_v28  ;;  %v182_v41 = vadd.f32 %v181_v39, %v69_v28  ;;  %v171_v42 = vpop.f32.mrb[3].mxu0  ;;  %v183_v43 = vpop.f32.mrb[3].mxu1 }
 0x107   :  { %v172_v44 = vadd.f32 %v171_v42, %v73_v29  ;;  %v184_v45 = vadd.f32 %v183_v43, %v73_v29 }
 0x108   :  { %187 = vst [vmem:[#allocation2 + $0x8] sm:$0xff] %v170_v40  ;;  %189 = vst [vmem:[#allocation2 + $0x18] sm:$0xff] %v182_v41 }
 0x109   :  { %191 = vst [vmem:[#allocation3 + $0x8] sm:$0xff] %v172_v44  ;;  %193 = vst [vmem:[#allocation3 + $0x18] sm:$0xff] %v184_v45 }
 0x10a   :  { %v275_v46 = vpop.f32.mrb[4].mxu1 }
 0x10b   :  { %v277_v47 = vpop.f32.mrb[5].mxu1  ;;  %v280_v49 = vld [vmem:[#allocation2] sm:$0xf]  ;;  %v394_v7 = vld [vmem:[#allocation2 + $0x4] sm:$0xf] }
 0x10c   :  { %v287_v48 = vsel %vm204_vm1, %v275_v46, %v277_v47  ;;  %v506_v32 = vld [vmem:[#allocation3 + $0x14] sm:$0xf] }
 0x10d   :  { %v508_v33 = vrot.slane %v506_v32, 4 }
 0x10f   :  { %v505_v34 = vld [vmem:[#allocation2 + $0x8] sm:$0xf] }
 0x110   :  { %v281_v50 = vld [vmem:[#allocation3 + $0x1c] sm:$0xf]  ;;  %v395_v5 = vld [vmem:[#allocation3 + $0x18] sm:$0xf]  ;;  %v510_v37 = vsel %vm285_vm2, %v505_v34, %v508_v33 }
 0x111   :  { %v283_v51 = vrot.slane %v281_v50, 4  ;;  %v397_v6 = vrot.slane %v395_v5, 4 }
 0x113   :  { %v286_v52 = vsel %vm285_vm2, %v280_v49, %v283_v51  ;;  %v399_v10 = vsel %vm285_vm2, %v394_v7, %v397_v6 }
 0x114   :  { %v288_v53 = vadd.f32 %v287_v48, %v286_v52 }
 0x116   :  { %1533 = vtanh.f32 %v288_v53  ;;  %v1362_v55 = vmul.f32 -1.442695, %v288_v53 }
 0x118   :  { %1535 = vpow2.f32 %v1362_v55 }
 0x120   :  { %v1534_v54 = vpop.eup %1533 }
 0x121   :  { %298 = vrot.lane.b32.xlu0 %v1534_v54, %s1670_s7  ;;  %v617_v54 = vld [vmem:[#allocation3 + $0x10] sm:$0xf] }
 0x122   :  { %v1536_v56 = vpop.eup %1535  ;;  %v619_v55 = vrot.slane %v617_v54, 4 }
 0x123   :  { %v292_v57 = vadd.f32 1.0, %v1536_v56  ;;  %v616_v56 = vld [vmem:[#allocation2 + $0xc] sm:$0xf] }
 0x125   :  { %1537 = vrcp.f32 %v292_v57 }
 0x12f   :  { %v1538_v58 = vpop.eup %1537 }
 0x130   :  { %v296_v61 = vmul.f32 0.0, %v1538_v58 }
 0x193   :  { %v299_v59 = vpop.permute.xlu0 %298 }
 0x194   :  { %v301_v60 = vmul.f32 %v1538_v58, %v299_v59  ;;  %v621_v59 = vsel %vm285_vm2, %v616_v56, %v619_v55 }
 0x196   :  { %303 = vrot.lane.b32.xlu0 %v301_v60, %s1676_s3 }
 0x208   :  { %v304_v62 = vpop.permute.xlu0 %303 }
 0x209   :  { %v306_v63 = vadd.f32 %v304_v62, %v296_v61 }
 0x20b   :  { %1539 = vtanh.f32 %v306_v63 }
 0x215   :  { %v1540_v1 = vpop.eup %1539 }
 0x216   :  { %309 = vrot.lane.b32.xlu1 %v1540_v1, %s1670_s7 }
 0x288   :  { %v310_v2 = vpop.permute.xlu1 %309 }
 0x289   :  { %v312_v3 = vmul.f32 %v1538_v58, %v310_v2 }
 0x28b   :  { %314 = vrot.lane.b32.xlu1 %v312_v3, %s1676_s3 }
 0x2fd   :  { %v315_v4 = vpop.permute.xlu1 %314 }
 0x2fe   :  { %318 = vst.msk [vmem:[#allocation4] sm:$0xf] %vm317_vm3, %v315_v4  ;;  %1363 = vmatmul.mubr.msk.f32.vlgmr.msra.gmra.mrb[6].mxu1 %vm205_vm5, %v315_v4 }
 0x2ff   :  { %320 = vst.msk [vmem:[#allocation5 + $0x18] sm:$0xf0] %vm319_vm4, %v315_v4  ;;  %1461 = vmatpush1.bf16.msra.mxu1 %v1761_v17  ;;  %609 = vmatprep.mubr.f32.mxu1 %v1675_v0 }
 0x300   :  { %1463 = vmatprep.subr.bf16.mxu1 %v1774_v21 }
 0x303   :  { %1465 = vmatpush1.bf16.msra.mxu1 %v1779_v22 }
 0x304   :  { %1475 = vmatprep.subr.bf16.mxu1 %v1748_v13 }
 0x3d1   :  { %v389_v8 = vpop.f32.mrb[6].mxu1 }
 0x3d2   :  { %v391_v9 = vpop.f32.mrb[7].mxu1 }
 0x3d3   :  { %v400_v11 = vsel %vm204_vm1, %v389_v8, %v391_v9 }
 0x3d4   :  { %v401_v12 = vadd.f32 %v400_v11, %v399_v10 }
 0x3d6   :  { %1541 = vtanh.f32 %v401_v12  ;;  %v1364_v15 = vmul.f32 -1.442695, %v401_v12  ;;  %v728_v12 = vld [vmem:[#allocation3 + $0xc] sm:$0xf] }
 0x3d8   :  { %1543 = vpow2.f32 %v1364_v15 }
 0x3e0   :  { %v1542_v14 = vpop.eup %1541 }
 0x3e1   :  { %411 = vrot.lane.b32.xlu0 %v1542_v14, %s1670_s7  ;;  %v730_v14 = vrot.slane %v728_v12, 4 }
 0x3e2   :  { %v1544_v16 = vpop.eup %1543 }
 0x3e3   :  { %v405_v18 = vadd.f32 1.0, %v1544_v16 }
 0x3e5   :  { %1545 = vrcp.f32 %v405_v18  ;;  %v727_v18 = vld [vmem:[#allocation2 + $0x10] sm:$0xf] }
 0x3ef   :  { %v1546_v19 = vpop.eup %1545 }
 0x3f0   :  { %v409_v25 = vmul.f32 %v1546_v19, %v306_v63 }
 0x453   :  { %v412_v20 = vpop.permute.xlu0 %411 }
 0x454   :  { %v414_v23 = vmul.f32 %v1546_v19, %v412_v20 }
 0x456   :  { %416 = vrot.lane.b32.xlu1 %v414_v23, %s1676_s3 }
 0x4c8   :  { %v417_v26 = vpop.permute.xlu1 %416 }
 0x4c9   :  { %v419_v27 = vadd.f32 %v417_v26, %v409_v25 }
 0x4cb   :  { %1547 = vtanh.f32 %v419_v27 }
 0x4d5   :  { %v1548_v28 = vpop.eup %1547 }
 0x4d6   :  { %422 = vrot.lane.b32.xlu0 %v1548_v28, %s1670_s7 }
 0x548   :  { %v423_v29 = vpop.permute.xlu0 %422 }
 0x549   :  { %v425_v30 = vmul.f32 %v1546_v19, %v423_v29  ;;  %v732_v19 = vsel %vm285_vm2, %v727_v18, %v730_v14 }
 0x54b   :  { %427 = vrot.lane.b32.xlu1 %v425_v30, %s1676_s3 }
 0x5bd   :  { %v428_v31 = vpop.permute.xlu1 %427 }
 0x5be   :  { %430 = vst.msk [vmem:[#allocation4 + $0x4] sm:$0xf] %vm317_vm3, %v428_v31  ;;  %1365 = vmatmul.mubr.msk.f32.vlgmr.msra.gmra.mrb[4].mxu0 %vm205_vm5, %v428_v31 }
 0x5bf   :  { %431 = vst.msk [vmem:[#allocation5 + $0x14] sm:$0xf0] %vm319_vm4, %v428_v31  ;;  %1469 = vmatpush1.bf16.msra.mxu0 %v1761_v17  ;;  %720 = vmatprep.mubr.f32.mxu0 %v1675_v0 }
 0x5c0   :  { %1471 = vmatprep.subr.bf16.mxu0 %v1774_v21 }
 0x5c3   :  { %1473 = vmatpush1.bf16.msra.mxu0 %v1779_v22 }
 0x5c4   :  { %1483 = vmatprep.subr.bf16.mxu0 %v1748_v13 }
 0x691   :  { %v500_v35 = vpop.f32.mrb[4].mxu0 }
 0x692   :  { %v502_v36 = vpop.f32.mrb[5].mxu0 }
 0x693   :  { %v511_v38 = vsel %vm204_vm1, %v500_v35, %v502_v36 }
 0x694   :  { %v512_v39 = vadd.f32 %v511_v38, %v510_v37 }
 0x696   :  { %1549 = vtanh.f32 %v512_v39  ;;  %v1366_v41 = vmul.f32 -1.442695, %v512_v39  ;;  %v839_v39 = vld [vmem:[#allocation3 + $0x8] sm:$0xf] }
 0x698   :  { %1551 = vpow2.f32 %v1366_v41 }
 0x6a0   :  { %v1550_v40 = vpop.eup %1549 }
 0x6a1   :  { %522 = vrot.lane.b32.xlu0 %v1550_v40, %s1670_s7  ;;  %v841_v40 = vrot.slane %v839_v39, 4  ;;  %v1103_v39 = vld [vmem:[%s1970_s4 + $0x28] sm:$0xff] }
 0x6a2   :  { %v1552_v42 = vpop.eup %1551 }
 0x6a3   :  { %v516_v43 = vadd.f32 1.0, %v1552_v42 }
 0x6a5   :  { %1553 = vrcp.f32 %v516_v43  ;;  %v838_v43 = vld [vmem:[#allocation2 + $0x14] sm:$0xf] }
 0x6af   :  { %v1554_v44 = vpop.eup %1553 }
 0x6b0   :  { %v520_v47 = vmul.f32 %v1554_v44, %v419_v27 }
 0x713   :  { %v523_v45 = vpop.permute.xlu0 %522 }
 0x714   :  { %v525_v46 = vmul.f32 %v1554_v44, %v523_v45 }
 0x716   :  { %527 = vrot.lane.b32.xlu1 %v525_v46, %s1676_s3 }
 0x788   :  { %v528_v48 = vpop.permute.xlu1 %527 }
 0x789   :  { %v530_v49 = vadd.f32 %v528_v48, %v520_v47 }
 0x78b   :  { %1555 = vtanh.f32 %v530_v49 }
 0x795   :  { %v1556_v50 = vpop.eup %1555 }
 0x796   :  { %533 = vrot.lane.b32.xlu0 %v1556_v50, %s1670_s7 }
 0x808   :  { %v534_v51 = vpop.permute.xlu0 %533 }
 0x809   :  { %v536_v52 = vmul.f32 %v1554_v44, %v534_v51  ;;  %v843_v44 = vsel %vm285_vm2, %v838_v43, %v841_v40  ;;  %v1104_v40 = vld [vmem:[%s1970_s4 + $0x30] sm:$0xff] }
 0x80b   :  { %538 = vrot.lane.b32.xlu1 %v536_v52, %s1676_s3 }
 0x87d   :  { %v539_v53 = vpop.permute.xlu1 %538 }
 0x87e   :  { %541 = vst.msk [vmem:[#allocation4 + $0x8] sm:$0xf] %vm317_vm3, %v539_v53  ;;  %1367 = vmatmul.mubr.msk.f32.vlgmr.msra.gmra.mrb[8].mxu1 %vm205_vm5, %v539_v53 }
 0x87f   :  { %542 = vst.msk [vmem:[#allocation5 + $0x10] sm:$0xf0] %vm319_vm4, %v539_v53  ;;  %1477 = vmatpush1.bf16.msra.mxu1 %v1761_v17  ;;  %831 = vmatprep.mubr.f32.mxu1 %v1675_v0 }
 0x880   :  { %1479 = vmatprep.subr.bf16.mxu1 %v1774_v21 }
 0x883   :  { %1481 = vmatpush1.bf16.msra.mxu1 %v1779_v22 }
 0x884   :  { %1491 = vmatprep.subr.bf16.mxu1 %v1748_v13 }
 0x951   :  { %v611_v57 = vpop.f32.mrb[8].mxu1 }
 0x952   :  { %v613_v58 = vpop.f32.mrb[9].mxu1 }
 0x953   :  { %v622_v60 = vsel %vm204_vm1, %v611_v57, %v613_v58  ;;  %v950_v57 = vld [vmem:[#allocation3 + $0x4] sm:$0xf] }
 0x954   :  { %v623_v61 = vadd.f32 %v622_v60, %v621_v59  ;;  %v952_v58 = vrot.slane %v950_v57, 4  ;;  %v949_v59 = vld [vmem:[#allocation2 + $0x18] sm:$0xf]  ;;  %v1385_v57 = vld [vmem:[%s1971_s5] ss:$0 sm:$0xff]  ;;  %s1641_s5 = scalar_lea.vmem %s1346_s12, 512 }
 0x955   :  { %p1642_p2 = scmp.ne.s32.totalorder %s1346_s12, %s1641_s5  ;;  %p1647_p4 = scmp.lt.s32.totalorder %s1641_s5, %s1641_s5 }
 0x956   :  { %1557 = vtanh.f32 %v623_v61  ;;  %v1368_v63 = vmul.f32 -1.442695, %v623_v61 }
 0x957   :  { %p1648_p5 = por %p1647_p4, %p1646_p3 }
 0x958   :  { %1559 = vpow2.f32 %v1368_v63 }
 0x959   :  { %p1649_p6 = pnand %p1648_p5, %p1642_p2 }
 0x960   :  { %v1558_v62 = vpop.eup %1557 }
 0x961   :  { %633 = vrot.lane.b32.xlu0 %v1558_v62, %s1670_s7  ;;  %v954_v62 = vsel %vm285_vm2, %v949_v59, %v952_v58 }
 0x962   :  { %v1560_v1 = vpop.eup %1559 }
 0x963   :  { %v627_v2 = vadd.f32 1.0, %v1560_v1 }
 0x965   :  { %1561 = vrcp.f32 %v627_v2 }
 0x96f   :  { %v1562_v13 = vpop.eup %1561 }
 0x970   :  { %v631_v5 = vmul.f32 %v1562_v13, %v530_v49 }
 0x9d3   :  { %v634_v3 = vpop.permute.xlu0 %633 }
 0x9d4   :  { %v636_v4 = vmul.f32 %v1562_v13, %v634_v3 }
 0x9d6   :  { %638 = vrot.lane.b32.xlu1 %v636_v4, %s1676_s3 }
 0xa48   :  { %v639_v6 = vpop.permute.xlu1 %638 }
 0xa49   :  { %v641_v7 = vadd.f32 %v639_v6, %v631_v5 }
 0xa4b   :  { %1563 = vtanh.f32 %v641_v7 }
 0xa55   :  { %v1564_v8 = vpop.eup %1563 }
 0xa56   :  { %644 = vrot.lane.b32.xlu0 %v1564_v8, %s1670_s7 }
 0xac8   :  { %v645_v9 = vpop.permute.xlu0 %644 }
 0xac9   :  { %v647_v10 = vmul.f32 %v1562_v13, %v645_v9 }
 0xacb   :  { %649 = vrot.lane.b32.xlu1 %v647_v10, %s1676_s3 }
 0xb3d   :  { %v650_v11 = vpop.permute.xlu1 %649 }
 0xb3e   :  { %652 = vst.msk [vmem:[#allocation4 + $0xc] sm:$0xf] %vm317_vm3, %v650_v11  ;;  %1369 = vmatmul.mubr.msk.f32.vlgmr.msra.gmra.mrb[6].mxu0 %vm205_vm5, %v650_v11 }
 0xb3f   :  { %653 = vst.msk [vmem:[#allocation5 + $0xc] sm:$0xf0] %vm319_vm4, %v650_v11  ;;  %1485 = vmatpush1.bf16.msra.mxu0 %v1761_v17  ;;  %942 = vmatprep.mubr.f32.mxu0 %v1675_v0 }
 0xb40   :  { %1487 = vmatprep.subr.bf16.mxu0 %v1774_v21 }
 0xb43   :  { %1489 = vmatpush1.bf16.msra.mxu0 %v1779_v22 }
 0xc11   :  { %v722_v15 = vpop.f32.mrb[6].mxu0 }
 0xc12   :  { %v724_v16 = vpop.f32.mrb[7].mxu0 }
 0xc13   :  { %v733_v20 = vsel %vm204_vm1, %v722_v15, %v724_v16  ;;  %v1061_v16 = vld [vmem:[#allocation3] sm:$0xf] }
 0xc14   :  { %v734_v23 = vadd.f32 %v733_v20, %v732_v19  ;;  %v1063_v18 = vrot.slane %v1061_v16, 4  ;;  %v1060_v19 = vld [vmem:[#allocation2 + $0x1c] sm:$0xf] }
 0xc16   :  { %1565 = vtanh.f32 %v734_v23  ;;  %v1370_v26 = vmul.f32 -1.442695, %v734_v23 }
 0xc18   :  { %1567 = vpow2.f32 %v1370_v26 }
 0xc20   :  { %v1566_v25 = vpop.eup %1565 }
 0xc21   :  { %744 = vrot.lane.b32.xlu0 %v1566_v25, %s1670_s7  ;;  %v1065_v25 = vsel %vm285_vm2, %v1060_v19, %v1063_v18 }
 0xc22   :  { %v1568_v27 = vpop.eup %1567 }
 0xc23   :  { %v738_v28 = vadd.f32 1.0, %v1568_v27 }
 0xc25   :  { %1569 = vrcp.f32 %v738_v28 }
 0xc2f   :  { %v1570_v29 = vpop.eup %1569 }
 0xc30   :  { %v742_v32 = vmul.f32 %v1570_v29, %v641_v7 }
 0xc93   :  { %v745_v30 = vpop.permute.xlu0 %744 }
 0xc94   :  { %v747_v31 = vmul.f32 %v1570_v29, %v745_v30 }
 0xc96   :  { %749 = vrot.lane.b32.xlu1 %v747_v31, %s1676_s3 }
 0xd08   :  { %v750_v33 = vpop.permute.xlu1 %749 }
 0xd09   :  { %v752_v34 = vadd.f32 %v750_v33, %v742_v32 }
 0xd0b   :  { %1571 = vtanh.f32 %v752_v34 }
 0xd15   :  { %v1572_v35 = vpop.eup %1571 }
 0xd16   :  { %755 = vrot.lane.b32.xlu0 %v1572_v35, %s1670_s7 }
 0xd88   :  { %v756_v36 = vpop.permute.xlu0 %755 }
 0xd89   :  { %v758_v37 = vmul.f32 %v1570_v29, %v756_v36 }
 0xd8b   :  { %760 = vrot.lane.b32.xlu1 %v758_v37, %s1676_s3 }
 0xdfd   :  { %v761_v38 = vpop.permute.xlu1 %760 }
 0xdfe   :  { %763 = vst.msk [vmem:[#allocation4 + $0x10] sm:$0xf] %vm317_vm3, %v761_v38  ;;  %1371 = vmatmul.mubr.msk.f32.vlgmr.msra.gmra.mrb[10].mxu1 %vm205_vm5, %v761_v38 }
 0xdff   :  { %764 = vst.msk [vmem:[#allocation5 + $0x8] sm:$0xf0] %vm319_vm4, %v761_v38  ;;  %1493 = vmatpush1.bf16.msra.mxu1 %v1761_v17  ;;  %1053 = vmatprep.mubr.f32.mxu1 %v1675_v0  ;;  %v1102_v38 = vld [vmem:[%s1970_s4 + $0x20] sm:$0xff] }
 0xe00   :  { %1495 = vmatprep.subr.bf16.mxu1 %v1774_v21 }
 0xe03   :  { %1497 = vmatpush1.bf16.msra.mxu1 %v1779_v22 }
 0xed1   :  { %v833_v41 = vpop.f32.mrb[10].mxu1 }
 0xed2   :  { %v835_v42 = vpop.f32.mrb[11].mxu1 }
 0xed3   :  { %v844_v45 = vsel %vm204_vm1, %v833_v41, %v835_v42  ;;  %v1498_v41 = vpack.c.bf16 %v1103_v39, %v1102_v38  ;;  %v1105_v42 = vld [vmem:[%s1970_s4 + $0x38] sm:$0xff] }
 0xed4   :  { %v845_v46 = vadd.f32 %v844_v45, %v843_v44  ;;  %v1502_v43 = vpack.c.bf16 %v1105_v42, %v1104_v40  ;;  %v1098_v44 = vld [vmem:[%s1970_s4] sm:$0xff]  ;;  %v1099_v45 = vld [vmem:[%s1970_s4 + $0x8] sm:$0xff] }
 0xed5   :  { %1499 = vmatprep.subr.bf16.mxu0 %v1498_v41 }
 0xed6   :  { %1573 = vtanh.f32 %v845_v46  ;;  %v1372_v0 = vmul.f32 -1.442695, %v845_v46  ;;  %v1506_v46 = vpack.c.bf16 %v1099_v45, %v1098_v44 }
 0xed8   :  { %1575 = vpow2.f32 %v1372_v0 }
 0xee0   :  { %v1574_v47 = vpop.eup %1573 }
 0xee1   :  { %855 = vrot.lane.b32.xlu0 %v1574_v47, %s1670_s7 }
 0xee2   :  { %v1576_v17 = vpop.eup %1575 }
 0xee3   :  { %v849_v21 = vadd.f32 1.0, %v1576_v17 }
 0xee5   :  { %1577 = vrcp.f32 %v849_v21  ;;  %v1100_v21 = vld [vmem:[%s1970_s4 + $0x10] sm:$0xff] }
 0xeef   :  { %v1578_v22 = vpop.eup %1577 }
 0xef0   :  { %v853_v50 = vmul.f32 %v1578_v22, %v752_v34 }
 0xf53   :  { %v856_v48 = vpop.permute.xlu0 %855 }
 0xf54   :  { %v858_v49 = vmul.f32 %v1578_v22, %v856_v48 }
 0xf56   :  { %860 = vrot.lane.b32.xlu1 %v858_v49, %s1676_s3 }
 0xfc8   :  { %v861_v51 = vpop.permute.xlu1 %860 }
 0xfc9   :  { %v863_v52 = vadd.f32 %v861_v51, %v853_v50  ;;  %v1112_v51 = vld [vmem:[#allocation5 + $0x10] sm:$0xff] }
 0xfcb   :  { %1579 = vtanh.f32 %v863_v52 }
 0xfd5   :  { %v1580_v53 = vpop.eup %1579 }
 0xfd6   :  { %866 = vrot.lane.b32.xlu0 %v1580_v53, %s1670_s7  ;;  %v1106_v53 = vld [vmem:[#allocation4] sm:$0xff] }
0x1048   :  { %v867_v54 = vpop.permute.xlu0 %866 }
0x1049   :  { %v869_v55 = vmul.f32 %v1578_v22, %v867_v54  ;;  %v1101_v22 = vld [vmem:[%s1970_s4 + $0x18] sm:$0xff]  ;;  %v1107_v54 = vld [vmem:[#allocation4 + $0x8] sm:$0xff] }
0x104a   :  { %v1510_v49 = vpack.c.bf16 %v1101_v22, %v1100_v21 }
0x104b   :  { %871 = vrot.lane.b32.xlu1 %v869_v55, %s1676_s3 }
0x10bd   :  { %v872_v56 = vpop.permute.xlu1 %871 }
0x10be   :  { %874 = vst.msk [vmem:[#allocation4 + $0x14] sm:$0xf] %vm317_vm3, %v872_v56  ;;  %1373 = vmatmul.mubr.msk.f32.vlgmr.msra.gmra.mrb[8].mxu0 %vm205_vm5, %v872_v56 }
0x10bf   :  { %875 = vst.msk [vmem:[#allocation5 + $0x4] sm:$0xf0] %vm319_vm4, %v872_v56  ;;  %1501 = vmatpush3.bf16.msra.mxu0 %v1498_v41 }
0x10c0   :  { %1503 = vmatprep.subr.bf16.mxu0 %v1502_v43 }
0x10c3   :  { %1505 = vmatpush3.bf16.msra.mxu0 %v1502_v43 }
0x10c4   :  { %1507 = vmatprep.subr.bf16.mxu0 %v1506_v46 }
0x10c5   :  { %v1108_v55 = vld [vmem:[#allocation4 + $0x10] sm:$0xff] }
0x10c6   :  { %v1111_v50 = vld [vmem:[#allocation5 + $0x8] sm:$0xff] }
0x1191   :  { %v944_v60 = vpop.f32.mrb[8].mxu0 }
0x1192   :  { %v946_v61 = vpop.f32.mrb[9].mxu0 }
0x1193   :  { %v955_v63 = vsel %vm204_vm1, %v944_v60, %v946_v61 }
0x1194   :  { %v956_v1 = vadd.f32 %v955_v63, %v954_v62 }
0x1196   :  { %1581 = vtanh.f32 %v956_v1  ;;  %v1374_v13 = vmul.f32 -1.442695, %v956_v1 }
0x1198   :  { %1583 = vpow2.f32 %v1374_v13 }
0x11a0   :  { %v1582_v2 = vpop.eup %1581 }
0x11a1   :  { %966 = vrot.lane.b32.xlu0 %v1582_v2, %s1670_s7 }
0x11a2   :  { %v1584_v3 = vpop.eup %1583 }
0x11a3   :  { %v960_v4 = vadd.f32 1.0, %v1584_v3 }
0x11a5   :  { %1585 = vrcp.f32 %v960_v4 }
0x11af   :  { %v1586_v5 = vpop.eup %1585 }
0x11b0   :  { %v964_v8 = vmul.f32 %v1586_v5, %v863_v52  ;;  %v1113_v52 = vld [vmem:[#allocation5 + $0x18] sm:$0xff] }
0x1213   :  { %v967_v6 = vpop.permute.xlu0 %966 }
0x1214   :  { %v969_v7 = vmul.f32 %v1586_v5, %v967_v6 }
0x1216   :  { %971 = vrot.lane.b32.xlu1 %v969_v7, %s1676_s3 }
0x1288   :  { %v972_v9 = vpop.permute.xlu1 %971 }
0x1289   :  { %v974_v10 = vadd.f32 %v972_v9, %v964_v8 }
0x128b   :  { %1587 = vtanh.f32 %v974_v10 }
0x1295   :  { %v1588_v11 = vpop.eup %1587 }
0x1296   :  { %977 = vrot.lane.b32.xlu0 %v1588_v11, %s1670_s7 }
0x1308   :  { %v978_v12 = vpop.permute.xlu0 %977 }
0x1309   :  { %v980_v14 = vmul.f32 %v1586_v5, %v978_v12 }
0x130b   :  { %982 = vrot.lane.b32.xlu1 %v980_v14, %s1676_s3 }
0x137d   :  { %v983_v15 = vpop.permute.xlu1 %982 }
0x137e   :  { %985 = vst.msk [vmem:[#allocation4 + $0x18] sm:$0xf] %vm317_vm3, %v983_v15  ;;  %1375 = vmatmul.mubr.msk.f32.vlgmr.msra.gmra.mrb[12].mxu1 %vm205_vm5, %v983_v15 }
0x137f   :  { %986 = vst.msk [vmem:[#allocation5] sm:$0xf0] %vm319_vm4, %v983_v15 }
0x1451   :  { %v1055_v20 = vpop.f32.mrb[12].mxu1 }
0x1452   :  { %v1057_v23 = vpop.f32.mrb[13].mxu1 }
0x1453   :  { %v1066_v26 = vsel %vm204_vm1, %v1055_v20, %v1057_v23 }
0x1454   :  { %v1067_v27 = vadd.f32 %v1066_v26, %v1065_v25 }
0x1456   :  { %1589 = vtanh.f32 %v1067_v27  ;;  %v1376_v29 = vmul.f32 -1.442695, %v1067_v27 }
0x1458   :  { %1591 = vpow2.f32 %v1376_v29 }
0x1460   :  { %v1590_v28 = vpop.eup %1589 }
0x1461   :  { %1077 = vrot.lane.b32.xlu0 %v1590_v28, %s1670_s7 }
0x1462   :  { %v1592_v30 = vpop.eup %1591 }
0x1463   :  { %v1071_v31 = vadd.f32 1.0, %v1592_v30 }
0x1465   :  { %1593 = vrcp.f32 %v1071_v31 }
0x146f   :  { %v1594_v32 = vpop.eup %1593 }
0x1470   :  { %v1075_v35 = vmul.f32 %v1594_v32, %v974_v10 }
0x14d3   :  { %v1078_v33 = vpop.permute.xlu0 %1077 }
0x14d4   :  { %v1080_v34 = vmul.f32 %v1594_v32, %v1078_v33 }
0x14d6   :  { %1082 = vrot.lane.b32.xlu1 %v1080_v34, %s1676_s3 }
0x1548   :  { %v1083_v36 = vpop.permute.xlu1 %1082 }
0x1549   :  { %v1085_v37 = vadd.f32 %v1083_v36, %v1075_v35 }
0x154b   :  { %1595 = vtanh.f32 %v1085_v37 }
0x1555   :  { %v1596_v24 = vpop.eup %1595 }
0x1556   :  { %1088 = vrot.lane.b32.xlu0 %v1596_v24, %s1670_s7 }
0x15c8   :  { %v1089_v47 = vpop.permute.xlu0 %1088 }
0x15c9   :  { %v1091_v0 = vmul.f32 %v1594_v32, %v1089_v47 }
0x15cb   :  { %1093 = vrot.lane.b32.xlu1 %v1091_v0, %s1676_s3 }
0x163d   :  { %v1094_v17 = vpop.permute.xlu1 %1093 }
0x163e   :  { %1096 = vst.msk [vmem:[#allocation4 + $0x1c] sm:$0xf] %vm317_vm3, %v1094_v17 }
0x163f   :  { %1097 = vst.msk [vmem:[#allocation5 - $0x4] sm:$0xf0] %vm319_vm4, %v1094_v17 }
0x1645   :  { %v1109_v56 = vld [vmem:[#allocation4 + $0x18] sm:$0xff] }
0x1646   :  { %v1110_v48 = vld [vmem:[#allocation5] sm:$0xff] }
0x1647   :  { %1410 = vmatprep.mubr.msk.f32.mxu0 %vm205_vm5, %v1110_v48 }
0x1648   :  { %1411 = vmatmul.mubr.msk.f32.vlgmr.msra.gmra.mrb[10].mxu0 %vm205_vm5, %v1111_v50 }
0x1649   :  { %1509 = vmatpush3.bf16.msra.mxu0 %v1506_v46  ;;  %1413 = vmatprep.mubr.msk.f32.mxu0 %vm205_vm5, %v1112_v51 }
0x164a   :  { %1511 = vmatprep.subr.bf16.mxu0 %v1510_v49 }
0x164c   :  { %1414 = vmatmul.mubr.msk.f32.gmra.mrb[12].mxu0 %vm205_vm5, %v1113_v52 }
0x164d   :  { %1513 = vmatpush3.bf16.msra.mxu0 %v1510_v49  ;;  %1424 = vmatprep.mubr.msk.f32.mxu0 %vm205_vm5, %v1106_v53 }
0x1650   :  { %1425 = vmatmul.mubr.msk.f32.vlgmr.msra.gmra.mrb[10].mxu0 %vm205_vm5, %v1107_v54 }
0x1651   :  { %1427 = vmatprep.mubr.msk.f32.mxu0 %vm205_vm5, %v1108_v55 }
0x1654   :  { %1428 = vmatmul.mubr.msk.f32.gmra.mrb[12].mxu0 %vm205_vm5, %v1109_v56 }
0x1723   :  { %v1426_v58 = vpop.f32.mrb[10].mxu0 }
0x1724   :  { %v1316_v59 = vadd.f32 %v1426_v58, %v1385_v57  ;;  %v1289_v60 = vpop.f32.mrb[11].mxu0 }
0x1725   :  { %v1315_v61 = vadd.f32 %v1385_v57, %v1289_v60 }
0x1726   :  { %v1324_v62 = vcombine.high %v1316_v59, %v1316_v59  ;;  %1334 = vst.msk [vmem:[#allocation11 + $0x8] sm:$0xf] %vm1331_vm6, %v1316_v59 }
0x1727   :  { %v1323_v63 = vcombine.high %v1315_v61, %v1315_v61  ;;  %1332 = vst.msk [vmem:[#allocation11] sm:$0xf] %vm1331_vm6, %v1315_v61  ;;  %v1429_v1 = vpop.f32.mrb[12].mxu0 }
0x1728   :  { %1335 = vst.msk [vmem:[#allocation11 + $0xc] sm:$0xf] %vm1331_vm6, %v1324_v62  ;;  %v1318_v2 = vadd.f32 %v1429_v1, %v1385_v57  ;;  %v1299_v13 = vpop.f32.mrb[13].mxu0 }
0x1729   :  { %1333 = vst.msk [vmem:[#allocation11 + $0x4] sm:$0xf] %vm1331_vm6, %v1323_v63  ;;  %v1317_v3 = vadd.f32 %v1385_v57, %v1299_v13 }
0x172a   :  { %v1326_v4 = vcombine.high %v1318_v2, %v1318_v2  ;;  %1338 = vst.msk [vmem:[#allocation11 + $0x18] sm:$0xf] %vm1331_vm6, %v1318_v2 }
0x172b   :  { %v1325_v5 = vcombine.high %v1317_v3, %v1317_v3  ;;  %1336 = vst.msk [vmem:[#allocation11 + $0x10] sm:$0xf] %vm1331_vm6, %v1317_v3 }
0x172c   :  { %1339 = vst.msk [vmem:[#allocation11 + $0x1c] sm:$0xf] %vm1331_vm6, %v1326_v4 }
0x172d   :  { %1337 = vst.msk [vmem:[#allocation11 + $0x14] sm:$0xf] %vm1331_vm6, %v1325_v5 }
0x172e   :  { %1652 = shalt.err (!%p1649_p6)
}
0x172f   :  { %s1653_s15 = scalar_lea.hbm %s1972_s6, 512 }
0x1730   :  { %p1654_p7 = scmp.ne.s32.totalorder %s1972_s6, %s1653_s15  ;;  %p1657_p8 = scmp.lt.u32.totalorder %s1653_s15, %s1972_s6 }
0x1732   :  { %p1659_p9 = pnand %p1657_p8, %p1654_p7 }
0x1734   :  { %1662 = shalt.err (!%p1659_p9)
}
0x1735   :  { %1351 = dma.vmem_to_hbm [thread:$0]  %s1346_s12, 512, %s1972_s6, [#allocation8], %s1670_s7, %s1670_s7, %s1671_s8  }
0x1736   :  { %1667 = dma.done.wait [#allocation8], 512  }
0x1737   :  { %1668 = vsyncadd [#allocation8], 4294966784 }
0x1738   :  { %1355 = vsyncpa [#allocation7], 1 }
0x1739   :  { %1356 = vsyncpa [#allocation10], 1 }
0x173a   :  { %1357 = vsyncpa [#allocation8], 1 }

</bundles_post_ra>
